<compile_context>
chip_gen: v7x
topology: tpu7x:2x2x1
jax: 0.10.0
libtpu: 0.0.40
codegen_flags: <defaults>
</compile_context>

<pallas_src>
import numpy as np
import jax
import jax.numpy as jnp
from jax.experimental import pallas as pl
from jax.experimental.pallas import tpu as pltpu

# ---------------- hyper-parameters (small, consistent with the module) --------
V = 50      # n_src_words
PAD = 0     # pad_idx
B = 2       # batch
S = 8       # source sequence length
D = 32      # d_word_vec == d_model
DI = 64     # d_inner
L = 2       # n_layers
H = 4       # n_heads
DK = 8      # d_k
DV = 8      # d_v   (H * DK == H * DV == D)
NPOS = 200  # n_positions
EPS = 1e-6
NEG = -1e9
SCALE = np.float32(1.0 / np.sqrt(DK))


# ---------------- fused encoder kernel (embed+LN + full layer stack) ----------
def encoder_kernel(x_ref, pos_ref, g0_ref, b0_ref, amask_ref,
                   wqkv_ref, bqkv_ref, wo_ref, bo_ref,
                   lng_ref, lnb_ref, w1_ref, b1_ref, w2_ref, b2_ref,
                   o_ref, qkv_s, ctx_s):
    def layernorm(x, g, b):
        mu = jnp.mean(x, axis=-1, keepdims=True)
        var = jnp.mean(jnp.square(x - mu), axis=-1, keepdims=True)
        return (x - mu) * jax.lax.rsqrt(var + EPS) * g + b

    # embedding + positional encoding + pre-stack LayerNorm (dropout = identity)
    h = layernorm(x_ref[...] + pos_ref[...], g0_ref[...], b0_ref[...])    # (S, D)

    amask = amask_ref[...]                    # (1, 1, S) additive mask, bcast over heads

    # Layer stack folded into the kernel (static unroll, L = 2).
    for l in range(L):
        lg = lng_ref[l]                       # (2, D) LN gammas (attn, ffn)
        lb = lnb_ref[l]                       # (2, D) LN betas

        # ---- multi-head self-attention ------------------------------------
        # single lane-dense fused Q/K/V projection: (S, D) @ (D, 3*H*DK)
        qkv = jnp.dot(h, wqkv_ref[l],
                      preferred_element_type=jnp.float32) + bqkv_ref[l]   # (S, 3*H*DK)
        # split heads once: 3H static lane-slice copies into a head-major scratch
        for n in range(3 * H):
            qkv_s[n] = qkv[:, n * DK:(n + 1) * DK]
        q = qkv_s[0 * H:1 * H]                # (H, S, DK)
        k = qkv_s[1 * H:2 * H]
        v = qkv_s[2 * H:3 * H]

        s = jnp.einsum('hqd,hkd->hqk', q, k,
                       preferred_element_type=jnp.float32) * SCALE        # (H, S, S)
        s = s + amask                          # 0 keep / -1e9 pad
        m = jnp.max(s, axis=-1, keepdims=True)
        e = jnp.exp(s - m)
        p = e * pl.reciprocal(jnp.sum(e, axis=-1, keepdims=True), approx=True)
        ctx = jnp.einsum('hqk,hkd->hqd', p, v,
                         preferred_element_type=jnp.float32)               # (H, S, DV)

        # concat heads into a lane-dense (S, H*DV) slab, then ONE MXU matmul
        # against Wo performs the head reduction (== concat-heads @ Wo).
        for hh in range(H):
            ctx_s[:, hh * DV:(hh + 1) * DV] = ctx[hh]
        attn = jnp.dot(ctx_s[...], wo_ref[l],
                       preferred_element_type=jnp.float32) + bo_ref[l]     # (S, D)
        h = layernorm(attn + h, lg[0:1], lb[0:1])

        # ---- position-wise feed-forward ------------------------------------
        u = jnp.dot(h, w1_ref[l], preferred_element_type=jnp.float32) + b1_ref[l]
        u = jnp.maximum(u, 0.0)
        u = jnp.dot(u, w2_ref[l], preferred_element_type=jnp.float32) + b2_ref[l]
        h = layernorm(u + h, lg[1:2], lb[1:2])

    # TODO(synk): output slab is (8,32) -> only 32/128 lanes; a lane-dense
    # (B, S*D) presentation would need a relayout around the matmuls.
    o_ref[...] = h


def run_encoder(x_emb_flat, pos, fin_g, fin_b, amask, packed):
    (wqkv, bqkv, wo, bo, ln_g, ln_b, w1, b1, w2, b2) = packed
    in_specs = [
        pl.BlockSpec((S, D), lambda b: (b, 0)),                    # token embeddings (flat)
        pl.BlockSpec((S, D), lambda b: (0, 0)),                    # positional encodings
        pl.BlockSpec((1, D), lambda b: (0, 0)),                    # pre-stack LN gamma
        pl.BlockSpec((1, D), lambda b: (0, 0)),                    # pre-stack LN beta
        pl.BlockSpec((1, 1, S), lambda b: (b, 0, 0)),              # additive pad mask (per batch)
        pl.BlockSpec((L, D, 3 * H * DK), lambda b: (0, 0, 0)),     # fused QKV weights (all layers)
        pl.BlockSpec((L, 1, 3 * H * DK), lambda b: (0, 0, 0)),     # fused QKV biases
        pl.BlockSpec((L, D, D), lambda b: (0, 0, 0)),              # out-proj weights
        pl.BlockSpec((L, 1, D), lambda b: (0, 0, 0)),              # out-proj bias
        pl.BlockSpec((L, 2, D), lambda b: (0, 0, 0)),              # LN gammas (attn, ffn)
        pl.BlockSpec((L, 2, D), lambda b: (0, 0, 0)),              # LN betas
        pl.BlockSpec((L, D, DI), lambda b: (0, 0, 0)),             # ffn w1
        pl.BlockSpec((L, 1, DI), lambda b: (0, 0, 0)),             # ffn b1
        pl.BlockSpec((L, DI, D), lambda b: (0, 0, 0)),             # ffn w2
        pl.BlockSpec((L, 1, D), lambda b: (0, 0, 0)),              # ffn b2
    ]
    out_specs = pl.BlockSpec((S, D), lambda b: (b, 0))
    return pl.pallas_call(
        encoder_kernel,
        out_shape=jax.ShapeDtypeStruct((B * S, D), jnp.float32),
        grid_spec=pltpu.PrefetchScalarGridSpec(
            num_scalar_prefetch=0,
            grid=(B,),                                             # batch only; layers in-kernel
            in_specs=in_specs,
            out_specs=out_specs,
            scratch_shapes=[pltpu.VMEM((3 * H, S, DK), jnp.float32),   # head-major QKV
                            pltpu.VMEM((S, H * DV), jnp.float32)],     # concat-heads slab
        ),
        compiler_params=pltpu.CompilerParams(
            dimension_semantics=("parallel",)),                    # v7x: one batch elem per TC
    )(x_emb_flat, pos, fin_g, fin_b, amask,
      wqkv, bqkv, wo, bo, ln_g, ln_b, w1, b1, w2, b2)


# ---------------- parameter construction / packing ----------------------------
def sinusoid_table(n_position, d_hid):
    pos = np.arange(n_position, dtype=np.float64)[:, None]
    hid = np.arange(d_hid)[None, :]
    angle = pos / np.power(10000.0, 2 * (hid // 2) / d_hid)
    table = angle.copy()
    table[:, 0::2] = np.sin(angle[:, 0::2])
    table[:, 1::2] = np.cos(angle[:, 1::2])
    return jnp.asarray(table[None], dtype=jnp.float32)   # (1, n_position, d_hid)


def make_params():
    key = jax.random.PRNGKey(0)
    ks = jax.random.split(key, 16)
    emb = (jax.random.normal(ks[0], (V, D), jnp.float32) * 0.1).at[PAD].set(0.0)
    wq = jax.random.normal(ks[1], (L, D, D), jnp.float32) * 0.08
    wk = jax.random.normal(ks[2], (L, D, D), jnp.float32) * 0.08
    wv = jax.random.normal(ks[3], (L, D, D), jnp.float32) * 0.08
    bq = jax.random.normal(ks[4], (L, D), jnp.float32) * 0.02
    bk = jax.random.normal(ks[5], (L, D), jnp.float32) * 0.02
    bv = jax.random.normal(ks[6], (L, D), jnp.float32) * 0.02
    wo = jax.random.normal(ks[7], (L, D, D), jnp.float32) * 0.08
    bo = jax.random.normal(ks[8], (L, D), jnp.float32) * 0.02
    ln_g = jnp.ones((L, 2, D), jnp.float32)
    ln_b = jnp.zeros((L, 2, D), jnp.float32)
    w1 = jax.random.normal(ks[9], (L, D, DI), jnp.float32) * 0.08
    b1 = jax.random.normal(ks[10], (L, DI), jnp.float32) * 0.02
    w2 = jax.random.normal(ks[11], (L, DI, D), jnp.float32) * 0.08
    b2 = jax.random.normal(ks[12], (L, D), jnp.float32) * 0.02
    fin_g = jnp.ones((1, D), jnp.float32)                 # Encoder.layer_norm
    fin_b = jnp.zeros((1, D), jnp.float32)
    raw = (wq, wk, wv, bq, bk, bv, wo, bo, ln_g, ln_b, w1, b1, w2, b2)
    return emb, raw, fin_g, fin_b, ks


def pack_params(raw):
    """Re-layout natural (PyTorch-style) params into the kernel's fused layout."""
    (wq, wk, wv, bq, bk, bv, wo, bo, ln_g, ln_b, w1, b1, w2, b2) = raw
    wqkv = jnp.concatenate([wq, wk, wv], axis=-1)                       # (L, D, 3*H*DK)
    bqkv = jnp.concatenate([bq, bk, bv], axis=-1).reshape(L, 1, 3 * H * DK)
    return (wqkv, bqkv, wo, bo.reshape(L, 1, D), ln_g, ln_b,
            w1, b1.reshape(L, 1, DI), w2, b2.reshape(L, 1, D))


# ---------------- pure-JAX reference (mirrors the PyTorch math) ----------------
def ref_forward(src_seq, src_mask, emb, pos_table, fin_g, fin_b, raw):
    (wq, wk, wv, bq, bk, bv, wo, bo, ln_g, ln_b, w1, b1, w2, b2) = raw

    def ln(x, g, b):
        mu = x.mean(-1, keepdims=True)
        var = ((x - mu) ** 2).mean(-1, keepdims=True)
        return (x - mu) / jnp.sqrt(var + EPS) * g + b

    x = jnp.take(emb, src_seq, axis=0) + pos_table[:, :src_seq.shape[1]]
    x = ln(x, fin_g.reshape(D), fin_b.reshape(D))
    for l in range(L):
        q = (x.reshape(-1, D) @ wq[l] + bq[l]).reshape(B, S, H, DK).transpose(0, 2, 1, 3)
        k = (x.reshape(-1, D) @ wk[l] + bk[l]).reshape(B, S, H, DK).transpose(0, 2, 1, 3)
        v = (x.reshape(-1, D) @ wv[l] + bv[l]).reshape(B, S, H, DV).transpose(0, 2, 1, 3)
        s = jnp.einsum('bhqd,bhkd->bhqk', q, k) * SCALE
        s = jnp.where(src_mask[:, None] > 0, s, NEG)
        p = jax.nn.softmax(s, axis=-1)
        o = jnp.einsum('bhqk,bhkd->bhqd', p, v).transpose(0, 2, 1, 3).reshape(-1, H * DV)
        o = o @ wo[l] + bo[l]
        x = ln(o.reshape(B, S, D) + x, ln_g[l, 0], ln_b[l, 0])
        u = jnp.maximum(x.reshape(-1, D) @ w1[l] + b1[l], 0.0) @ w2[l] + b2[l]
        x = ln(u.reshape(B, S, D) + x, ln_g[l, 1], ln_b[l, 1])
    return x


# ---------------- main ---------------------------------------------------------
if __name__ == "__main__":
    emb, raw, fin_g, fin_b, ks = make_params()
    pos_table = sinusoid_table(NPOS, D)                     # (1, NPOS, D)

    # inputs
    src_seq = jax.random.randint(ks[13], (B, S), 1, V)
    src_seq = src_seq.at[0, S - 2:].set(PAD)                # some padding in batch 0
    src_mask = (src_seq != PAD)[:, None, :].astype(jnp.float32)   # (B, 1, S), 1 = keep

    # glue (outside the kernel): embedding gather, positional slice, additive mask
    x_emb = jnp.take(emb, src_seq, axis=0).reshape(B * S, D)      # (B*S, D)
    pos = pos_table[0, :S]                                         # (S, D)
    amask = (src_mask - 1.0) * 1e9                                 # (B, 1, S): 0 keep / -1e9 pad

    enc_flat = run_encoder(x_emb, pos, fin_g, fin_b, amask, pack_params(raw))
    enc_out = jax.block_until_ready(enc_flat).reshape(B, S, D)

    # correctness vs. pure-JAX reference of the PyTorch forward
    ref = ref_forward(src_seq, src_mask, emb, pos_table, fin_g, fin_b, raw)
    np.testing.assert_allclose(np.asarray(enc_out), np.asarray(ref),
                               rtol=1e-2, atol=1e-2)
    print("KERNEL_OK")
</pallas_src>

<mosaic_0001>
module attributes {stable_mosaic.version = 11 : i64} {
  func.func @encoder_kernel(%arg0: i32, %arg1: memref<8x32xf32, #tpu.memory_space<vmem>>, %arg2: memref<8x32xf32, #tpu.memory_space<vmem>>, %arg3: memref<1x32xf32, #tpu.memory_space<vmem>>, %arg4: memref<1x32xf32, #tpu.memory_space<vmem>>, %arg5: memref<1x1x8xf32, #tpu.memory_space<vmem>>, %arg6: memref<2x32x96xf32, #tpu.memory_space<vmem>>, %arg7: memref<2x1x96xf32, #tpu.memory_space<vmem>>, %arg8: memref<2x32x32xf32, #tpu.memory_space<vmem>>, %arg9: memref<2x1x32xf32, #tpu.memory_space<vmem>>, %arg10: memref<2x2x32xf32, #tpu.memory_space<vmem>>, %arg11: memref<2x2x32xf32, #tpu.memory_space<vmem>>, %arg12: memref<2x32x64xf32, #tpu.memory_space<vmem>>, %arg13: memref<2x1x64xf32, #tpu.memory_space<vmem>>, %arg14: memref<2x64x32xf32, #tpu.memory_space<vmem>>, %arg15: memref<2x1x32xf32, #tpu.memory_space<vmem>>, %arg16: memref<8x32xf32, #tpu.memory_space<vmem>>, %arg17: memref<12x8x8xf32, #tpu.memory_space<vmem>>, %arg18: memref<8x32xf32, #tpu.memory_space<vmem>>) attributes {dimension_semantics = [#tpu.dimension_semantics<parallel>], iteration_bounds = array<i64: 2>, scalar_prefetch = 0 : i64, scratch_operands = 2 : i64, tpu.core_type = #tpu.core_type<tc>, window_params = [{transform_indices = @transform_0, window_bounds = array<i64: 8, 32>}, {pipeline_mode = #tpu.pipeline_mode<synchronous>, transform_indices = @transform_1, window_bounds = array<i64: 8, 32>}, {pipeline_mode = #tpu.pipeline_mode<synchronous>, transform_indices = @transform_2, window_bounds = array<i64: 1, 32>}, {pipeline_mode = #tpu.pipeline_mode<synchronous>, transform_indices = @transform_3, window_bounds = array<i64: 1, 32>}, {transform_indices = @transform_4, window_bounds = array<i64: 1, 1, 8>}, {pipeline_mode = #tpu.pipeline_mode<synchronous>, transform_indices = @transform_5, window_bounds = array<i64: 2, 32, 96>}, {pipeline_mode = #tpu.pipeline_mode<synchronous>, transform_indices = @transform_6, window_bounds = array<i64: 2, 1, 96>}, {pipeline_mode = #tpu.pipeline_mode<synchronous>, transform_indices = @transform_7, window_bounds = array<i64: 2, 32, 32>}, {pipeline_mode = #tpu.pipeline_mode<synchronous>, transform_indices = @transform_8, window_bounds = array<i64: 2, 1, 32>}, {pipeline_mode = #tpu.pipeline_mode<synchronous>, transform_indices = @transform_9, window_bounds = array<i64: 2, 2, 32>}, {pipeline_mode = #tpu.pipeline_mode<synchronous>, transform_indices = @transform_10, window_bounds = array<i64: 2, 2, 32>}, {pipeline_mode = #tpu.pipeline_mode<synchronous>, transform_indices = @transform_11, window_bounds = array<i64: 2, 32, 64>}, {pipeline_mode = #tpu.pipeline_mode<synchronous>, transform_indices = @transform_12, window_bounds = array<i64: 2, 1, 64>}, {pipeline_mode = #tpu.pipeline_mode<synchronous>, transform_indices = @transform_13, window_bounds = array<i64: 2, 64, 32>}, {pipeline_mode = #tpu.pipeline_mode<synchronous>, transform_indices = @transform_14, window_bounds = array<i64: 2, 1, 32>}, {transform_indices = @transform_15, window_bounds = array<i64: 8, 32>}]} {
    %c0 = arith.constant 0 : index
    %c0_0 = arith.constant 0 : index
    %0 = vector.load %arg1[%c0, %c0_0] : memref<8x32xf32, #tpu.memory_space<vmem>>, vector<8x32xf32>
    %c0_1 = arith.constant 0 : index
    %c0_2 = arith.constant 0 : index
    %1 = vector.load %arg2[%c0_1, %c0_2] : memref<8x32xf32, #tpu.memory_space<vmem>>, vector<8x32xf32>
    %2 = arith.addf %0, %1 : vector<8x32xf32>
    %c0_3 = arith.constant 0 : index
    %c0_4 = arith.constant 0 : index
    %3 = vector.load %arg3[%c0_3, %c0_4] : memref<1x32xf32, #tpu.memory_space<vmem>>, vector<1x32xf32>
    %c0_5 = arith.constant 0 : index
    %c0_6 = arith.constant 0 : index
    %4 = vector.load %arg4[%c0_5, %c0_6] : memref<1x32xf32, #tpu.memory_space<vmem>>, vector<1x32xf32>
    %cst = arith.constant dense<0.000000e+00> : vector<8xf32>
    %5 = vector.multi_reduction <add>, %2, %cst [1] : vector<8x32xf32> to vector<8xf32>
    %6 = vector.shape_cast %5 : vector<8xf32> to vector<8x1xf32>
    %cst_7 = arith.constant 3.200000e+01 : f32
    %7 = vector.broadcast %cst_7 : f32 to vector<8x1xf32>
    %8 = arith.divf %6, %7 : vector<8x1xf32>
    %9 = vector.broadcast %8 : vector<8x1xf32> to vector<8x32xf32>
    %10 = arith.subf %2, %9 : vector<8x32xf32>
    %11 = arith.mulf %10, %10 : vector<8x32xf32>
    %cst_8 = arith.constant dense<0.000000e+00> : vector<8xf32>
    %12 = vector.multi_reduction <add>, %11, %cst_8 [1] : vector<8x32xf32> to vector<8xf32>
    %13 = vector.shape_cast %12 : vector<8xf32> to vector<8x1xf32>
    %cst_9 = arith.constant 3.200000e+01 : f32
    %14 = vector.broadcast %cst_9 : f32 to vector<8x1xf32>
    %15 = arith.divf %13, %14 : vector<8x1xf32>
    %16 = vector.broadcast %8 : vector<8x1xf32> to vector<8x32xf32>
    %17 = arith.subf %2, %16 : vector<8x32xf32>
    %cst_10 = arith.constant 9.99999997E-7 : f32
    %18 = vector.broadcast %cst_10 : f32 to vector<8x1xf32>
    %19 = arith.addf %15, %18 : vector<8x1xf32>
    %20 = math.rsqrt %19 : vector<8x1xf32>
    %21 = vector.broadcast %20 : vector<8x1xf32> to vector<8x32xf32>
    %22 = arith.mulf %17, %21 : vector<8x32xf32>
    %23 = vector.broadcast %3 : vector<1x32xf32> to vector<8x32xf32>
    %24 = arith.mulf %22, %23 : vector<8x32xf32>
    %25 = vector.broadcast %4 : vector<1x32xf32> to vector<8x32xf32>
    %26 = arith.addf %24, %25 : vector<8x32xf32>
    %c0_11 = arith.constant 0 : index
    %c0_12 = arith.constant 0 : index
    %c0_13 = arith.constant 0 : index
    %27 = vector.load %arg5[%c0_11, %c0_12, %c0_13] : memref<1x1x8xf32, #tpu.memory_space<vmem>>, vector<1x1x8xf32>
    %c0_14 = arith.constant 0 : index
    %c0_15 = arith.constant 0 : index
    %c0_16 = arith.constant 0 : index
    %28 = vector.load %arg10[%c0_14, %c0_15, %c0_16] : memref<2x2x32xf32, #tpu.memory_space<vmem>>, vector<1x2x32xf32>
    %29 = vector.shape_cast %28 : vector<1x2x32xf32> to vector<2x32xf32>
    %c0_17 = arith.constant 0 : index
    %c0_18 = arith.constant 0 : index
    %c0_19 = arith.constant 0 : index
    %30 = vector.load %arg11[%c0_17, %c0_18, %c0_19] : memref<2x2x32xf32, #tpu.memory_space<vmem>>, vector<1x2x32xf32>
    %31 = vector.shape_cast %30 : vector<1x2x32xf32> to vector<2x32xf32>
    %c0_20 = arith.constant 0 : index
    %c0_21 = arith.constant 0 : index
    %c0_22 = arith.constant 0 : index
    %32 = vector.load %arg6[%c0_20, %c0_21, %c0_22] : memref<2x32x96xf32, #tpu.memory_space<vmem>>, vector<1x32x96xf32>
    %33 = vector.shape_cast %32 : vector<1x32x96xf32> to vector<32x96xf32>
    %cst_23 = arith.constant dense<0.000000e+00> : vector<8x96xf32>
    %34 = tpu.matmul %26, %33, %cst_23 {dimension_numbers = #tpu.dot_dimension_numbers<[1], [0], [0], [1], [0, 0, 1, 1], [], []>} : vector<8x32xf32>, vector<32x96xf32>, vector<8x96xf32> -> vector<8x96xf32>
    %c0_24 = arith.constant 0 : index
    %c0_25 = arith.constant 0 : index
    %c0_26 = arith.constant 0 : index
    %35 = vector.load %arg7[%c0_24, %c0_25, %c0_26] : memref<2x1x96xf32, #tpu.memory_space<vmem>>, vector<1x1x96xf32>
    %36 = vector.shape_cast %35 : vector<1x1x96xf32> to vector<1x96xf32>
    %37 = vector.broadcast %36 : vector<1x96xf32> to vector<8x96xf32>
    %38 = arith.addf %34, %37 : vector<8x96xf32>
    %39 = vector.extract_strided_slice %38 {offsets = [0, 0], sizes = [8, 8], strides = [1, 1]} : vector<8x96xf32> to vector<8x8xf32>
    %c0_27 = arith.constant 0 : index
    %c0_28 = arith.constant 0 : index
    %c0_29 = arith.constant 0 : index
    %40 = vector.load %arg17[%c0_27, %c0_28, %c0_29] : memref<12x8x8xf32, #tpu.memory_space<vmem>>, vector<1x8x8xf32>
    %41 = vector.shape_cast %40 : vector<1x8x8xf32> to vector<8x8xf32>
    %42 = vector.shape_cast %39 : vector<8x8xf32> to vector<1x8x8xf32>
    tpu.vector_store %arg17[%c0_27, %c0_28, %c0_29], %42 {strides = array<i32>} : memref<12x8x8xf32, #tpu.memory_space<vmem>>, vector<1x8x8xf32>,
    %43 = vector.extract_strided_slice %38 {offsets = [0, 8], sizes = [8, 8], strides = [1, 1]} : vector<8x96xf32> to vector<8x8xf32>
    %c1 = arith.constant 1 : index
    %c0_30 = arith.constant 0 : index
    %c0_31 = arith.constant 0 : index
    %44 = vector.load %arg17[%c1, %c0_30, %c0_31] : memref<12x8x8xf32, #tpu.memory_space<vmem>>, vector<1x8x8xf32>
    %45 = vector.shape_cast %44 : vector<1x8x8xf32> to vector<8x8xf32>
    %46 = vector.shape_cast %43 : vector<8x8xf32> to vector<1x8x8xf32>
    tpu.vector_store %arg17[%c1, %c0_30, %c0_31], %46 {strides = array<i32>} : memref<12x8x8xf32, #tpu.memory_space<vmem>>, vector<1x8x8xf32>,
    %47 = vector.extract_strided_slice %38 {offsets = [0, 16], sizes = [8, 8], strides = [1, 1]} : vector<8x96xf32> to vector<8x8xf32>
    %c2 = arith.constant 2 : index
    %c0_32 = arith.constant 0 : index
    %c0_33 = arith.constant 0 : index
    %48 = vector.load %arg17[%c2, %c0_32, %c0_33] : memref<12x8x8xf32, #tpu.memory_space<vmem>>, vector<1x8x8xf32>
    %49 = vector.shape_cast %48 : vector<1x8x8xf32> to vector<8x8xf32>
    %50 = vector.shape_cast %47 : vector<8x8xf32> to vector<1x8x8xf32>
    tpu.vector_store %arg17[%c2, %c0_32, %c0_33], %50 {strides = array<i32>} : memref<12x8x8xf32, #tpu.memory_space<vmem>>, vector<1x8x8xf32>,
    %51 = vector.extract_strided_slice %38 {offsets = [0, 24], sizes = [8, 8], strides = [1, 1]} : vector<8x96xf32> to vector<8x8xf32>
    %c3 = arith.constant 3 : index
    %c0_34 = arith.constant 0 : index
    %c0_35 = arith.constant 0 : index
    %52 = vector.load %arg17[%c3, %c0_34, %c0_35] : memref<12x8x8xf32, #tpu.memory_space<vmem>>, vector<1x8x8xf32>
    %53 = vector.shape_cast %52 : vector<1x8x8xf32> to vector<8x8xf32>
    %54 = vector.shape_cast %51 : vector<8x8xf32> to vector<1x8x8xf32>
    tpu.vector_store %arg17[%c3, %c0_34, %c0_35], %54 {strides = array<i32>} : memref<12x8x8xf32, #tpu.memory_space<vmem>>, vector<1x8x8xf32>,
    %55 = vector.extract_strided_slice %38 {offsets = [0, 32], sizes = [8, 8], strides = [1, 1]} : vector<8x96xf32> to vector<8x8xf32>
    %c4 = arith.constant 4 : index
    %c0_36 = arith.constant 0 : index
    %c0_37 = arith.constant 0 : index
    %56 = vector.load %arg17[%c4, %c0_36, %c0_37] : memref<12x8x8xf32, #tpu.memory_space<vmem>>, vector<1x8x8xf32>
    %57 = vector.shape_cast %56 : vector<1x8x8xf32> to vector<8x8xf32>
    %58 = vector.shape_cast %55 : vector<8x8xf32> to vector<1x8x8xf32>
    tpu.vector_store %arg17[%c4, %c0_36, %c0_37], %58 {strides = array<i32>} : memref<12x8x8xf32, #tpu.memory_space<vmem>>, vector<1x8x8xf32>,
    %59 = vector.extract_strided_slice %38 {offsets = [0, 40], sizes = [8, 8], strides = [1, 1]} : vector<8x96xf32> to vector<8x8xf32>
    %c5 = arith.constant 5 : index
    %c0_38 = arith.constant 0 : index
    %c0_39 = arith.constant 0 : index
    %60 = vector.load %arg17[%c5, %c0_38, %c0_39] : memref<12x8x8xf32, #tpu.memory_space<vmem>>, vector<1x8x8xf32>
    %61 = vector.shape_cast %60 : vector<1x8x8xf32> to vector<8x8xf32>
    %62 = vector.shape_cast %59 : vector<8x8xf32> to vector<1x8x8xf32>
    tpu.vector_store %arg17[%c5, %c0_38, %c0_39], %62 {strides = array<i32>} : memref<12x8x8xf32, #tpu.memory_space<vmem>>, vector<1x8x8xf32>,
    %63 = vector.extract_strided_slice %38 {offsets = [0, 48], sizes = [8, 8], strides = [1, 1]} : vector<8x96xf32> to vector<8x8xf32>
    %c6 = arith.constant 6 : index
    %c0_40 = arith.constant 0 : index
    %c0_41 = arith.constant 0 : index
    %64 = vector.load %arg17[%c6, %c0_40, %c0_41] : memref<12x8x8xf32, #tpu.memory_space<vmem>>, vector<1x8x8xf32>
    %65 = vector.shape_cast %64 : vector<1x8x8xf32> to vector<8x8xf32>
    %66 = vector.shape_cast %63 : vector<8x8xf32> to vector<1x8x8xf32>
    tpu.vector_store %arg17[%c6, %c0_40, %c0_41], %66 {strides = array<i32>} : memref<12x8x8xf32, #tpu.memory_space<vmem>>, vector<1x8x8xf32>,
    %67 = vector.extract_strided_slice %38 {offsets = [0, 56], sizes = [8, 8], strides = [1, 1]} : vector<8x96xf32> to vector<8x8xf32>
    %c7 = arith.constant 7 : index
    %c0_42 = arith.constant 0 : index
    %c0_43 = arith.constant 0 : index
    %68 = vector.load %arg17[%c7, %c0_42, %c0_43] : memref<12x8x8xf32, #tpu.memory_space<vmem>>, vector<1x8x8xf32>
    %69 = vector.shape_cast %68 : vector<1x8x8xf32> to vector<8x8xf32>
    %70 = vector.shape_cast %67 : vector<8x8xf32> to vector<1x8x8xf32>
    tpu.vector_store %arg17[%c7, %c0_42, %c0_43], %70 {strides = array<i32>} : memref<12x8x8xf32, #tpu.memory_space<vmem>>, vector<1x8x8xf32>,
    %71 = vector.extract_strided_slice %38 {offsets = [0, 64], sizes = [8, 8], strides = [1, 1]} : vector<8x96xf32> to vector<8x8xf32>
    %c8 = arith.constant 8 : index
    %c0_44 = arith.constant 0 : index
    %c0_45 = arith.constant 0 : index
    %72 = vector.load %arg17[%c8, %c0_44, %c0_45] : memref<12x8x8xf32, #tpu.memory_space<vmem>>, vector<1x8x8xf32>
    %73 = vector.shape_cast %72 : vector<1x8x8xf32> to vector<8x8xf32>
    %74 = vector.shape_cast %71 : vector<8x8xf32> to vector<1x8x8xf32>
    tpu.vector_store %arg17[%c8, %c0_44, %c0_45], %74 {strides = array<i32>} : memref<12x8x8xf32, #tpu.memory_space<vmem>>, vector<1x8x8xf32>,
    %75 = vector.extract_strided_slice %38 {offsets = [0, 72], sizes = [8, 8], strides = [1, 1]} : vector<8x96xf32> to vector<8x8xf32>
    %c9 = arith.constant 9 : index
    %c0_46 = arith.constant 0 : index
    %c0_47 = arith.constant 0 : index
    %76 = vector.load %arg17[%c9, %c0_46, %c0_47] : memref<12x8x8xf32, #tpu.memory_space<vmem>>, vector<1x8x8xf32>
    %77 = vector.shape_cast %76 : vector<1x8x8xf32> to vector<8x8xf32>
    %78 = vector.shape_cast %75 : vector<8x8xf32> to vector<1x8x8xf32>
    tpu.vector_store %arg17[%c9, %c0_46, %c0_47], %78 {strides = array<i32>} : memref<12x8x8xf32, #tpu.memory_space<vmem>>, vector<1x8x8xf32>,
    %79 = vector.extract_strided_slice %38 {offsets = [0, 80], sizes = [8, 8], strides = [1, 1]} : vector<8x96xf32> to vector<8x8xf32>
    %c10 = arith.constant 10 : index
    %c0_48 = arith.constant 0 : index
    %c0_49 = arith.constant 0 : index
    %80 = vector.load %arg17[%c10, %c0_48, %c0_49] : memref<12x8x8xf32, #tpu.memory_space<vmem>>, vector<1x8x8xf32>
    %81 = vector.shape_cast %80 : vector<1x8x8xf32> to vector<8x8xf32>
    %82 = vector.shape_cast %79 : vector<8x8xf32> to vector<1x8x8xf32>
    tpu.vector_store %arg17[%c10, %c0_48, %c0_49], %82 {strides = array<i32>} : memref<12x8x8xf32, #tpu.memory_space<vmem>>, vector<1x8x8xf32>,
    %83 = vector.extract_strided_slice %38 {offsets = [0, 88], sizes = [8, 8], strides = [1, 1]} : vector<8x96xf32> to vector<8x8xf32>
    %c11 = arith.constant 11 : index
    %c0_50 = arith.constant 0 : index
    %c0_51 = arith.constant 0 : index
    %84 = vector.load %arg17[%c11, %c0_50, %c0_51] : memref<12x8x8xf32, #tpu.memory_space<vmem>>, vector<1x8x8xf32>
    %85 = vector.shape_cast %84 : vector<1x8x8xf32> to vector<8x8xf32>
    %86 = vector.shape_cast %83 : vector<8x8xf32> to vector<1x8x8xf32>
    tpu.vector_store %arg17[%c11, %c0_50, %c0_51], %86 {strides = array<i32>} : memref<12x8x8xf32, #tpu.memory_space<vmem>>, vector<1x8x8xf32>,
    %c0_52 = arith.constant 0 : index
    %c0_53 = arith.constant 0 : index
    %c0_54 = arith.constant 0 : index
    %87 = vector.load %arg17[%c0_52, %c0_53, %c0_54] : memref<12x8x8xf32, #tpu.memory_space<vmem>>, vector<4x8x8xf32>
    %c4_55 = arith.constant 4 : index
    %c0_56 = arith.constant 0 : index
    %c0_57 = arith.constant 0 : index
    %88 = vector.load %arg17[%c4_55, %c0_56, %c0_57] : memref<12x8x8xf32, #tpu.memory_space<vmem>>, vector<4x8x8xf32>
    %c8_58 = arith.constant 8 : index
    %c0_59 = arith.constant 0 : index
    %c0_60 = arith.constant 0 : index
    %89 = vector.load %arg17[%c8_58, %c0_59, %c0_60] : memref<12x8x8xf32, #tpu.memory_space<vmem>>, vector<4x8x8xf32>
    "tpu.trace_start"() <{level = 10 : i32, message = "hqd,hkd->hqk"}> : () -> ()
    %cst_61 = arith.constant dense<0.000000e+00> : vector<4x8x8xf32>
    %90 = tpu.matmul %87, %88, %cst_61 {dimension_numbers = #tpu.dot_dimension_numbers<[2], [2], [1], [1], [0, 0, 0, 1, 1, 1], [0], [0]>} : vector<4x8x8xf32>, vector<4x8x8xf32>, vector<4x8x8xf32> -> vector<4x8x8xf32>
    "tpu.trace_stop"() : () -> ()
    %cst_62 = arith.constant 0.353553385 : f32
    %91 = vector.broadcast %cst_62 : f32 to vector<4x8x8xf32>
    %92 = arith.mulf %90, %91 : vector<4x8x8xf32>
    %93 = vector.broadcast %27 : vector<1x1x8xf32> to vector<4x8x8xf32>
    %94 = arith.addf %92, %93 : vector<4x8x8xf32>
    %cst_63 = arith.constant dense<0xFF800000> : vector<4x8xf32>
    %95 = vector.multi_reduction <maximumf>, %94, %cst_63 [2] : vector<4x8x8xf32> to vector<4x8xf32>
    %96 = vector.shape_cast %95 : vector<4x8xf32> to vector<4x8x1xf32>
    %97 = vector.broadcast %96 : vector<4x8x1xf32> to vector<4x8x8xf32>
    %98 = arith.subf %94, %97 : vector<4x8x8xf32>
    %99 = math.exp %98 : vector<4x8x8xf32>
    %cst_64 = arith.constant dense<0.000000e+00> : vector<4x8xf32>
    %100 = vector.multi_reduction <add>, %99, %cst_64 [2] : vector<4x8x8xf32> to vector<4x8xf32>
    %101 = vector.shape_cast %100 : vector<4x8xf32> to vector<4x8x1xf32>
    %102 = tpu.reciprocal %101 {approx = true} : vector<4x8x1xf32> -> vector<4x8x1xf32>
    %103 = vector.broadcast %102 : vector<4x8x1xf32> to vector<4x8x8xf32>
    %104 = arith.mulf %99, %103 : vector<4x8x8xf32>
    "tpu.trace_start"() <{level = 10 : i32, message = "hqk,hkd->hqd"}> : () -> ()
    %cst_65 = arith.constant dense<0.000000e+00> : vector<4x8x8xf32>
    %105 = tpu.matmul %104, %89, %cst_65 {dimension_numbers = #tpu.dot_dimension_numbers<[2], [1], [1], [2], [0, 0, 0, 1, 1, 2], [0], [0]>} : vector<4x8x8xf32>, vector<4x8x8xf32>, vector<4x8x8xf32> -> vector<4x8x8xf32>
    "tpu.trace_stop"() : () -> ()
    %106 = vector.extract_strided_slice %105 {offsets = [0, 0, 0], sizes = [1, 8, 8], strides = [1, 1, 1]} : vector<4x8x8xf32> to vector<1x8x8xf32>
    %107 = vector.shape_cast %106 : vector<1x8x8xf32> to vector<8x8xf32>
    %c0_66 = arith.constant 0 : index
    %c0_67 = arith.constant 0 : index
    %108 = vector.load %arg18[%c0_66, %c0_67] : memref<8x32xf32, #tpu.memory_space<vmem>>, vector<8x8xf32>
    tpu.vector_store %arg18[%c0_66, %c0_67], %107 {strides = array<i32>} : memref<8x32xf32, #tpu.memory_space<vmem>>, vector<8x8xf32>,
    %109 = vector.extract_strided_slice %105 {offsets = [1, 0, 0], sizes = [1, 8, 8], strides = [1, 1, 1]} : vector<4x8x8xf32> to vector<1x8x8xf32>
    %110 = vector.shape_cast %109 : vector<1x8x8xf32> to vector<8x8xf32>
    %c0_68 = arith.constant 0 : index
    %c8_69 = arith.constant 8 : index
    %111 = vector.load %arg18[%c0_68, %c8_69] : memref<8x32xf32, #tpu.memory_space<vmem>>, vector<8x8xf32>
    tpu.vector_store %arg18[%c0_68, %c8_69], %110 {strides = array<i32>} : memref<8x32xf32, #tpu.memory_space<vmem>>, vector<8x8xf32>,
    %112 = vector.extract_strided_slice %105 {offsets = [2, 0, 0], sizes = [1, 8, 8], strides = [1, 1, 1]} : vector<4x8x8xf32> to vector<1x8x8xf32>
    %113 = vector.shape_cast %112 : vector<1x8x8xf32> to vector<8x8xf32>
    %c0_70 = arith.constant 0 : index
    %c16 = arith.constant 16 : index
    %114 = vector.load %arg18[%c0_70, %c16] : memref<8x32xf32, #tpu.memory_space<vmem>>, vector<8x8xf32>
    tpu.vector_store %arg18[%c0_70, %c16], %113 {strides = array<i32>} : memref<8x32xf32, #tpu.memory_space<vmem>>, vector<8x8xf32>,
    %115 = vector.extract_strided_slice %105 {offsets = [3, 0, 0], sizes = [1, 8, 8], strides = [1, 1, 1]} : vector<4x8x8xf32> to vector<1x8x8xf32>
    %116 = vector.shape_cast %115 : vector<1x8x8xf32> to vector<8x8xf32>
    %c0_71 = arith.constant 0 : index
    %c24 = arith.constant 24 : index
    %117 = vector.load %arg18[%c0_71, %c24] : memref<8x32xf32, #tpu.memory_space<vmem>>, vector<8x8xf32>
    tpu.vector_store %arg18[%c0_71, %c24], %116 {strides = array<i32>} : memref<8x32xf32, #tpu.memory_space<vmem>>, vector<8x8xf32>,
    %c0_72 = arith.constant 0 : index
    %c0_73 = arith.constant 0 : index
    %118 = vector.load %arg18[%c0_72, %c0_73] : memref<8x32xf32, #tpu.memory_space<vmem>>, vector<8x32xf32>
    %c0_74 = arith.constant 0 : index
    %c0_75 = arith.constant 0 : index
    %c0_76 = arith.constant 0 : index
    %119 = vector.load %arg8[%c0_74, %c0_75, %c0_76] : memref<2x32x32xf32, #tpu.memory_space<vmem>>, vector<1x32x32xf32>
    %120 = vector.shape_cast %119 : vector<1x32x32xf32> to vector<32x32xf32>
    %cst_77 = arith.constant dense<0.000000e+00> : vector<8x32xf32>
    %121 = tpu.matmul %118, %120, %cst_77 {dimension_numbers = #tpu.dot_dimension_numbers<[1], [0], [0], [1], [0, 0, 1, 1], [], []>} : vector<8x32xf32>, vector<32x32xf32>, vector<8x32xf32> -> vector<8x32xf32>
    %c0_78 = arith.constant 0 : index
    %c0_79 = arith.constant 0 : index
    %c0_80 = arith.constant 0 : index
    %122 = vector.load %arg9[%c0_78, %c0_79, %c0_80] : memref<2x1x32xf32, #tpu.memory_space<vmem>>, vector<1x1x32xf32>
    %123 = vector.shape_cast %122 : vector<1x1x32xf32> to vector<1x32xf32>
    %124 = vector.broadcast %123 : vector<1x32xf32> to vector<8x32xf32>
    %125 = arith.addf %121, %124 : vector<8x32xf32>
    %126 = arith.addf %125, %26 : vector<8x32xf32>
    %127 = vector.extract_strided_slice %29 {offsets = [0, 0], sizes = [1, 32], strides = [1, 1]} : vector<2x32xf32> to vector<1x32xf32>
    %128 = vector.extract_strided_slice %31 {offsets = [0, 0], sizes = [1, 32], strides = [1, 1]} : vector<2x32xf32> to vector<1x32xf32>
    %cst_81 = arith.constant dense<0.000000e+00> : vector<8xf32>
    %129 = vector.multi_reduction <add>, %126, %cst_81 [1] : vector<8x32xf32> to vector<8xf32>
    %130 = vector.shape_cast %129 : vector<8xf32> to vector<8x1xf32>
    %cst_82 = arith.constant 3.200000e+01 : f32
    %131 = vector.broadcast %cst_82 : f32 to vector<8x1xf32>
    %132 = arith.divf %130, %131 : vector<8x1xf32>
    %133 = vector.broadcast %132 : vector<8x1xf32> to vector<8x32xf32>
    %134 = arith.subf %126, %133 : vector<8x32xf32>
    %135 = arith.mulf %134, %134 : vector<8x32xf32>
    %cst_83 = arith.constant dense<0.000000e+00> : vector<8xf32>
    %136 = vector.multi_reduction <add>, %135, %cst_83 [1] : vector<8x32xf32> to vector<8xf32>
    %137 = vector.shape_cast %136 : vector<8xf32> to vector<8x1xf32>
    %cst_84 = arith.constant 3.200000e+01 : f32
    %138 = vector.broadcast %cst_84 : f32 to vector<8x1xf32>
    %139 = arith.divf %137, %138 : vector<8x1xf32>
    %140 = vector.broadcast %132 : vector<8x1xf32> to vector<8x32xf32>
    %141 = arith.subf %126, %140 : vector<8x32xf32>
    %cst_85 = arith.constant 9.99999997E-7 : f32
    %142 = vector.broadcast %cst_85 : f32 to vector<8x1xf32>
    %143 = arith.addf %139, %142 : vector<8x1xf32>
    %144 = math.rsqrt %143 : vector<8x1xf32>
    %145 = vector.broadcast %144 : vector<8x1xf32> to vector<8x32xf32>
    %146 = arith.mulf %141, %145 : vector<8x32xf32>
    %147 = vector.broadcast %127 : vector<1x32xf32> to vector<8x32xf32>
    %148 = arith.mulf %146, %147 : vector<8x32xf32>
    %149 = vector.broadcast %128 : vector<1x32xf32> to vector<8x32xf32>
    %150 = arith.addf %148, %149 : vector<8x32xf32>
    %c0_86 = arith.constant 0 : index
    %c0_87 = arith.constant 0 : index
    %c0_88 = arith.constant 0 : index
    %151 = vector.load %arg12[%c0_86, %c0_87, %c0_88] : memref<2x32x64xf32, #tpu.memory_space<vmem>>, vector<1x32x64xf32>
    %152 = vector.shape_cast %151 : vector<1x32x64xf32> to vector<32x64xf32>
    %cst_89 = arith.constant dense<0.000000e+00> : vector<8x64xf32>
    %153 = tpu.matmul %150, %152, %cst_89 {dimension_numbers = #tpu.dot_dimension_numbers<[1], [0], [0], [1], [0, 0, 1, 1], [], []>} : vector<8x32xf32>, vector<32x64xf32>, vector<8x64xf32> -> vector<8x64xf32>
    %c0_90 = arith.constant 0 : index
    %c0_91 = arith.constant 0 : index
    %c0_92 = arith.constant 0 : index
    %154 = vector.load %arg13[%c0_90, %c0_91, %c0_92] : memref<2x1x64xf32, #tpu.memory_space<vmem>>, vector<1x1x64xf32>
    %155 = vector.shape_cast %154 : vector<1x1x64xf32> to vector<1x64xf32>
    %156 = vector.broadcast %155 : vector<1x64xf32> to vector<8x64xf32>
    %157 = arith.addf %153, %156 : vector<8x64xf32>
    %cst_93 = arith.constant 0.000000e+00 : f32
    %158 = vector.broadcast %cst_93 : f32 to vector<8x64xf32>
    %159 = arith.maximumf %157, %158 : vector<8x64xf32>
    %c0_94 = arith.constant 0 : index
    %c0_95 = arith.constant 0 : index
    %c0_96 = arith.constant 0 : index
    %160 = vector.load %arg14[%c0_94, %c0_95, %c0_96] : memref<2x64x32xf32, #tpu.memory_space<vmem>>, vector<1x64x32xf32>
    %161 = vector.shape_cast %160 : vector<1x64x32xf32> to vector<64x32xf32>
    %cst_97 = arith.constant dense<0.000000e+00> : vector<8x32xf32>
    %162 = tpu.matmul %159, %161, %cst_97 {dimension_numbers = #tpu.dot_dimension_numbers<[1], [0], [0], [1], [0, 0, 1, 1], [], []>} : vector<8x64xf32>, vector<64x32xf32>, vector<8x32xf32> -> vector<8x32xf32>
    %c0_98 = arith.constant 0 : index
    %c0_99 = arith.constant 0 : index
    %c0_100 = arith.constant 0 : index
    %163 = vector.load %arg15[%c0_98, %c0_99, %c0_100] : memref<2x1x32xf32, #tpu.memory_space<vmem>>, vector<1x1x32xf32>
    %164 = vector.shape_cast %163 : vector<1x1x32xf32> to vector<1x32xf32>
    %165 = vector.broadcast %164 : vector<1x32xf32> to vector<8x32xf32>
    %166 = arith.addf %162, %165 : vector<8x32xf32>
    %167 = arith.addf %166, %150 : vector<8x32xf32>
    %168 = vector.extract_strided_slice %29 {offsets = [1, 0], sizes = [1, 32], strides = [1, 1]} : vector<2x32xf32> to vector<1x32xf32>
    %169 = vector.extract_strided_slice %31 {offsets = [1, 0], sizes = [1, 32], strides = [1, 1]} : vector<2x32xf32> to vector<1x32xf32>
    %cst_101 = arith.constant dense<0.000000e+00> : vector<8xf32>
    %170 = vector.multi_reduction <add>, %167, %cst_101 [1] : vector<8x32xf32> to vector<8xf32>
    %171 = vector.shape_cast %170 : vector<8xf32> to vector<8x1xf32>
    %cst_102 = arith.constant 3.200000e+01 : f32
    %172 = vector.broadcast %cst_102 : f32 to vector<8x1xf32>
    %173 = arith.divf %171, %172 : vector<8x1xf32>
    %174 = vector.broadcast %173 : vector<8x1xf32> to vector<8x32xf32>
    %175 = arith.subf %167, %174 : vector<8x32xf32>
    %176 = arith.mulf %175, %175 : vector<8x32xf32>
    %cst_103 = arith.constant dense<0.000000e+00> : vector<8xf32>
    %177 = vector.multi_reduction <add>, %176, %cst_103 [1] : vector<8x32xf32> to vector<8xf32>
    %178 = vector.shape_cast %177 : vector<8xf32> to vector<8x1xf32>
    %cst_104 = arith.constant 3.200000e+01 : f32
    %179 = vector.broadcast %cst_104 : f32 to vector<8x1xf32>
    %180 = arith.divf %178, %179 : vector<8x1xf32>
    %181 = vector.broadcast %173 : vector<8x1xf32> to vector<8x32xf32>
    %182 = arith.subf %167, %181 : vector<8x32xf32>
    %cst_105 = arith.constant 9.99999997E-7 : f32
    %183 = vector.broadcast %cst_105 : f32 to vector<8x1xf32>
    %184 = arith.addf %180, %183 : vector<8x1xf32>
    %185 = math.rsqrt %184 : vector<8x1xf32>
    %186 = vector.broadcast %185 : vector<8x1xf32> to vector<8x32xf32>
    %187 = arith.mulf %182, %186 : vector<8x32xf32>
    %188 = vector.broadcast %168 : vector<1x32xf32> to vector<8x32xf32>
    %189 = arith.mulf %187, %188 : vector<8x32xf32>
    %190 = vector.broadcast %169 : vector<1x32xf32> to vector<8x32xf32>
    %191 = arith.addf %189, %190 : vector<8x32xf32>
    %c1_106 = arith.constant 1 : index
    %c0_107 = arith.constant 0 : index
    %c0_108 = arith.constant 0 : index
    %192 = vector.load %arg10[%c1_106, %c0_107, %c0_108] : memref<2x2x32xf32, #tpu.memory_space<vmem>>, vector<1x2x32xf32>
    %193 = vector.shape_cast %192 : vector<1x2x32xf32> to vector<2x32xf32>
    %c1_109 = arith.constant 1 : index
    %c0_110 = arith.constant 0 : index
    %c0_111 = arith.constant 0 : index
    %194 = vector.load %arg11[%c1_109, %c0_110, %c0_111] : memref<2x2x32xf32, #tpu.memory_space<vmem>>, vector<1x2x32xf32>
    %195 = vector.shape_cast %194 : vector<1x2x32xf32> to vector<2x32xf32>
    %c1_112 = arith.constant 1 : index
    %c0_113 = arith.constant 0 : index
    %c0_114 = arith.constant 0 : index
    %196 = vector.load %arg6[%c1_112, %c0_113, %c0_114] : memref<2x32x96xf32, #tpu.memory_space<vmem>>, vector<1x32x96xf32>
    %197 = vector.shape_cast %196 : vector<1x32x96xf32> to vector<32x96xf32>
    %cst_115 = arith.constant dense<0.000000e+00> : vector<8x96xf32>
    %198 = tpu.matmul %191, %197, %cst_115 {dimension_numbers = #tpu.dot_dimension_numbers<[1], [0], [0], [1], [0, 0, 1, 1], [], []>} : vector<8x32xf32>, vector<32x96xf32>, vector<8x96xf32> -> vector<8x96xf32>
    %c1_116 = arith.constant 1 : index
    %c0_117 = arith.constant 0 : index
    %c0_118 = arith.constant 0 : index
    %199 = vector.load %arg7[%c1_116, %c0_117, %c0_118] : memref<2x1x96xf32, #tpu.memory_space<vmem>>, vector<1x1x96xf32>
    %200 = vector.shape_cast %199 : vector<1x1x96xf32> to vector<1x96xf32>
    %201 = vector.broadcast %200 : vector<1x96xf32> to vector<8x96xf32>
    %202 = arith.addf %198, %201 : vector<8x96xf32>
    %203 = vector.extract_strided_slice %202 {offsets = [0, 0], sizes = [8, 8], strides = [1, 1]} : vector<8x96xf32> to vector<8x8xf32>
    %c0_119 = arith.constant 0 : index
    %c0_120 = arith.constant 0 : index
    %c0_121 = arith.constant 0 : index
    %204 = vector.load %arg17[%c0_119, %c0_120, %c0_121] : memref<12x8x8xf32, #tpu.memory_space<vmem>>, vector<1x8x8xf32>
    %205 = vector.shape_cast %204 : vector<1x8x8xf32> to vector<8x8xf32>
    %206 = vector.shape_cast %203 : vector<8x8xf32> to vector<1x8x8xf32>
    tpu.vector_store %arg17[%c0_119, %c0_120, %c0_121], %206 {strides = array<i32>} : memref<12x8x8xf32, #tpu.memory_space<vmem>>, vector<1x8x8xf32>,
    %207 = vector.extract_strided_slice %202 {offsets = [0, 8], sizes = [8, 8], strides = [1, 1]} : vector<8x96xf32> to vector<8x8xf32>
    %c1_122 = arith.constant 1 : index
    %c0_123 = arith.constant 0 : index
    %c0_124 = arith.constant 0 : index
    %208 = vector.load %arg17[%c1_122, %c0_123, %c0_124] : memref<12x8x8xf32, #tpu.memory_space<vmem>>, vector<1x8x8xf32>
    %209 = vector.shape_cast %208 : vector<1x8x8xf32> to vector<8x8xf32>
    %210 = vector.shape_cast %207 : vector<8x8xf32> to vector<1x8x8xf32>
    tpu.vector_store %arg17[%c1_122, %c0_123, %c0_124], %210 {strides = array<i32>} : memref<12x8x8xf32, #tpu.memory_space<vmem>>, vector<1x8x8xf32>,
    %211 = vector.extract_strided_slice %202 {offsets = [0, 16], sizes = [8, 8], strides = [1, 1]} : vector<8x96xf32> to vector<8x8xf32>
    %c2_125 = arith.constant 2 : index
    %c0_126 = arith.constant 0 : index
    %c0_127 = arith.constant 0 : index
    %212 = vector.load %arg17[%c2_125, %c0_126, %c0_127] : memref<12x8x8xf32, #tpu.memory_space<vmem>>, vector<1x8x8xf32>
    %213 = vector.shape_cast %212 : vector<1x8x8xf32> to vector<8x8xf32>
    %214 = vector.shape_cast %211 : vector<8x8xf32> to vector<1x8x8xf32>
    tpu.vector_store %arg17[%c2_125, %c0_126, %c0_127], %214 {strides = array<i32>} : memref<12x8x8xf32, #tpu.memory_space<vmem>>, vector<1x8x8xf32>,
    %215 = vector.extract_strided_slice %202 {offsets = [0, 24], sizes = [8, 8], strides = [1, 1]} : vector<8x96xf32> to vector<8x8xf32>
    %c3_128 = arith.constant 3 : index
    %c0_129 = arith.constant 0 : index
    %c0_130 = arith.constant 0 : index
    %216 = vector.load %arg17[%c3_128, %c0_129, %c0_130] : memref<12x8x8xf32, #tpu.memory_space<vmem>>, vector<1x8x8xf32>
    %217 = vector.shape_cast %216 : vector<1x8x8xf32> to vector<8x8xf32>
    %218 = vector.shape_cast %215 : vector<8x8xf32> to vector<1x8x8xf32>
    tpu.vector_store %arg17[%c3_128, %c0_129, %c0_130], %218 {strides = array<i32>} : memref<12x8x8xf32, #tpu.memory_space<vmem>>, vector<1x8x8xf32>,
    %219 = vector.extract_strided_slice %202 {offsets = [0, 32], sizes = [8, 8], strides = [1, 1]} : vector<8x96xf32> to vector<8x8xf32>
    %c4_131 = arith.constant 4 : index
    %c0_132 = arith.constant 0 : index
    %c0_133 = arith.constant 0 : index
    %220 = vector.load %arg17[%c4_131, %c0_132, %c0_133] : memref<12x8x8xf32, #tpu.memory_space<vmem>>, vector<1x8x8xf32>
    %221 = vector.shape_cast %220 : vector<1x8x8xf32> to vector<8x8xf32>
    %222 = vector.shape_cast %219 : vector<8x8xf32> to vector<1x8x8xf32>
    tpu.vector_store %arg17[%c4_131, %c0_132, %c0_133], %222 {strides = array<i32>} : memref<12x8x8xf32, #tpu.memory_space<vmem>>, vector<1x8x8xf32>,
    %223 = vector.extract_strided_slice %202 {offsets = [0, 40], sizes = [8, 8], strides = [1, 1]} : vector<8x96xf32> to vector<8x8xf32>
    %c5_134 = arith.constant 5 : index
    %c0_135 = arith.constant 0 : index
    %c0_136 = arith.constant 0 : index
    %224 = vector.load %arg17[%c5_134, %c0_135, %c0_136] : memref<12x8x8xf32, #tpu.memory_space<vmem>>, vector<1x8x8xf32>
    %225 = vector.shape_cast %224 : vector<1x8x8xf32> to vector<8x8xf32>
    %226 = vector.shape_cast %223 : vector<8x8xf32> to vector<1x8x8xf32>
    tpu.vector_store %arg17[%c5_134, %c0_135, %c0_136], %226 {strides = array<i32>} : memref<12x8x8xf32, #tpu.memory_space<vmem>>, vector<1x8x8xf32>,
    %227 = vector.extract_strided_slice %202 {offsets = [0, 48], sizes = [8, 8], strides = [1, 1]} : vector<8x96xf32> to vector<8x8xf32>
    %c6_137 = arith.constant 6 : index
    %c0_138 = arith.constant 0 : index
    %c0_139 = arith.constant 0 : index
    %228 = vector.load %arg17[%c6_137, %c0_138, %c0_139] : memref<12x8x8xf32, #tpu.memory_space<vmem>>, vector<1x8x8xf32>
    %229 = vector.shape_cast %228 : vector<1x8x8xf32> to vector<8x8xf32>
    %230 = vector.shape_cast %227 : vector<8x8xf32> to vector<1x8x8xf32>
    tpu.vector_store %arg17[%c6_137, %c0_138, %c0_139], %230 {strides = array<i32>} : memref<12x8x8xf32, #tpu.memory_space<vmem>>, vector<1x8x8xf32>,
    %231 = vector.extract_strided_slice %202 {offsets = [0, 56], sizes = [8, 8], strides = [1, 1]} : vector<8x96xf32> to vector<8x8xf32>
    %c7_140 = arith.constant 7 : index
    %c0_141 = arith.constant 0 : index
    %c0_142 = arith.constant 0 : index
    %232 = vector.load %arg17[%c7_140, %c0_141, %c0_142] : memref<12x8x8xf32, #tpu.memory_space<vmem>>, vector<1x8x8xf32>
    %233 = vector.shape_cast %232 : vector<1x8x8xf32> to vector<8x8xf32>
    %234 = vector.shape_cast %231 : vector<8x8xf32> to vector<1x8x8xf32>
    tpu.vector_store %arg17[%c7_140, %c0_141, %c0_142], %234 {strides = array<i32>} : memref<12x8x8xf32, #tpu.memory_space<vmem>>, vector<1x8x8xf32>,
    %235 = vector.extract_strided_slice %202 {offsets = [0, 64], sizes = [8, 8], strides = [1, 1]} : vector<8x96xf32> to vector<8x8xf32>
    %c8_143 = arith.constant 8 : index
    %c0_144 = arith.constant 0 : index
    %c0_145 = arith.constant 0 : index
    %236 = vector.load %arg17[%c8_143, %c0_144, %c0_145] : memref<12x8x8xf32, #tpu.memory_space<vmem>>, vector<1x8x8xf32>
    %237 = vector.shape_cast %236 : vector<1x8x8xf32> to vector<8x8xf32>
    %238 = vector.shape_cast %235 : vector<8x8xf32> to vector<1x8x8xf32>
    tpu.vector_store %arg17[%c8_143, %c0_144, %c0_145], %238 {strides = array<i32>} : memref<12x8x8xf32, #tpu.memory_space<vmem>>, vector<1x8x8xf32>,
    %239 = vector.extract_strided_slice %202 {offsets = [0, 72], sizes = [8, 8], strides = [1, 1]} : vector<8x96xf32> to vector<8x8xf32>
    %c9_146 = arith.constant 9 : index
    %c0_147 = arith.constant 0 : index
    %c0_148 = arith.constant 0 : index
    %240 = vector.load %arg17[%c9_146, %c0_147, %c0_148] : memref<12x8x8xf32, #tpu.memory_space<vmem>>, vector<1x8x8xf32>
    %241 = vector.shape_cast %240 : vector<1x8x8xf32> to vector<8x8xf32>
    %242 = vector.shape_cast %239 : vector<8x8xf32> to vector<1x8x8xf32>
    tpu.vector_store %arg17[%c9_146, %c0_147, %c0_148], %242 {strides = array<i32>} : memref<12x8x8xf32, #tpu.memory_space<vmem>>, vector<1x8x8xf32>,
    %243 = vector.extract_strided_slice %202 {offsets = [0, 80], sizes = [8, 8], strides = [1, 1]} : vector<8x96xf32> to vector<8x8xf32>
    %c10_149 = arith.constant 10 : index
    %c0_150 = arith.constant 0 : index
    %c0_151 = arith.constant 0 : index
    %244 = vector.load %arg17[%c10_149, %c0_150, %c0_151] : memref<12x8x8xf32, #tpu.memory_space<vmem>>, vector<1x8x8xf32>
    %245 = vector.shape_cast %244 : vector<1x8x8xf32> to vector<8x8xf32>
    %246 = vector.shape_cast %243 : vector<8x8xf32> to vector<1x8x8xf32>
    tpu.vector_store %arg17[%c10_149, %c0_150, %c0_151], %246 {strides = array<i32>} : memref<12x8x8xf32, #tpu.memory_space<vmem>>, vector<1x8x8xf32>,
    %247 = vector.extract_strided_slice %202 {offsets = [0, 88], sizes = [8, 8], strides = [1, 1]} : vector<8x96xf32> to vector<8x8xf32>
    %c11_152 = arith.constant 11 : index
    %c0_153 = arith.constant 0 : index
    %c0_154 = arith.constant 0 : index
    %248 = vector.load %arg17[%c11_152, %c0_153, %c0_154] : memref<12x8x8xf32, #tpu.memory_space<vmem>>, vector<1x8x8xf32>
    %249 = vector.shape_cast %248 : vector<1x8x8xf32> to vector<8x8xf32>
    %250 = vector.shape_cast %247 : vector<8x8xf32> to vector<1x8x8xf32>
    tpu.vector_store %arg17[%c11_152, %c0_153, %c0_154], %250 {strides = array<i32>} : memref<12x8x8xf32, #tpu.memory_space<vmem>>, vector<1x8x8xf32>,
    %c0_155 = arith.constant 0 : index
    %c0_156 = arith.constant 0 : index
    %c0_157 = arith.constant 0 : index
    %251 = vector.load %arg17[%c0_155, %c0_156, %c0_157] : memref<12x8x8xf32, #tpu.memory_space<vmem>>, vector<4x8x8xf32>
    %c4_158 = arith.constant 4 : index
    %c0_159 = arith.constant 0 : index
    %c0_160 = arith.constant 0 : index
    %252 = vector.load %arg17[%c4_158, %c0_159, %c0_160] : memref<12x8x8xf32, #tpu.memory_space<vmem>>, vector<4x8x8xf32>
    %c8_161 = arith.constant 8 : index
    %c0_162 = arith.constant 0 : index
    %c0_163 = arith.constant 0 : index
    %253 = vector.load %arg17[%c8_161, %c0_162, %c0_163] : memref<12x8x8xf32, #tpu.memory_space<vmem>>, vector<4x8x8xf32>
    "tpu.trace_start"() <{level = 10 : i32, message = "hqd,hkd->hqk"}> : () -> ()
    %cst_164 = arith.constant dense<0.000000e+00> : vector<4x8x8xf32>
    %254 = tpu.matmul %251, %252, %cst_164 {dimension_numbers = #tpu.dot_dimension_numbers<[2], [2], [1], [1], [0, 0, 0, 1, 1, 1], [0], [0]>} : vector<4x8x8xf32>, vector<4x8x8xf32>, vector<4x8x8xf32> -> vector<4x8x8xf32>
    "tpu.trace_stop"() : () -> ()
    %cst_165 = arith.constant 0.353553385 : f32
    %255 = vector.broadcast %cst_165 : f32 to vector<4x8x8xf32>
    %256 = arith.mulf %254, %255 : vector<4x8x8xf32>
    %257 = vector.broadcast %27 : vector<1x1x8xf32> to vector<4x8x8xf32>
    %258 = arith.addf %256, %257 : vector<4x8x8xf32>
    %cst_166 = arith.constant dense<0xFF800000> : vector<4x8xf32>
    %259 = vector.multi_reduction <maximumf>, %258, %cst_166 [2] : vector<4x8x8xf32> to vector<4x8xf32>
    %260 = vector.shape_cast %259 : vector<4x8xf32> to vector<4x8x1xf32>
    %261 = vector.broadcast %260 : vector<4x8x1xf32> to vector<4x8x8xf32>
    %262 = arith.subf %258, %261 : vector<4x8x8xf32>
    %263 = math.exp %262 : vector<4x8x8xf32>
    %cst_167 = arith.constant dense<0.000000e+00> : vector<4x8xf32>
    %264 = vector.multi_reduction <add>, %263, %cst_167 [2] : vector<4x8x8xf32> to vector<4x8xf32>
    %265 = vector.shape_cast %264 : vector<4x8xf32> to vector<4x8x1xf32>
    %266 = tpu.reciprocal %265 {approx = true} : vector<4x8x1xf32> -> vector<4x8x1xf32>
    %267 = vector.broadcast %266 : vector<4x8x1xf32> to vector<4x8x8xf32>
    %268 = arith.mulf %263, %267 : vector<4x8x8xf32>
    "tpu.trace_start"() <{level = 10 : i32, message = "hqk,hkd->hqd"}> : () -> ()
    %cst_168 = arith.constant dense<0.000000e+00> : vector<4x8x8xf32>
    %269 = tpu.matmul %268, %253, %cst_168 {dimension_numbers = #tpu.dot_dimension_numbers<[2], [1], [1], [2], [0, 0, 0, 1, 1, 2], [0], [0]>} : vector<4x8x8xf32>, vector<4x8x8xf32>, vector<4x8x8xf32> -> vector<4x8x8xf32>
    "tpu.trace_stop"() : () -> ()
    %270 = vector.extract_strided_slice %269 {offsets = [0, 0, 0], sizes = [1, 8, 8], strides = [1, 1, 1]} : vector<4x8x8xf32> to vector<1x8x8xf32>
    %271 = vector.shape_cast %270 : vector<1x8x8xf32> to vector<8x8xf32>
    %c0_169 = arith.constant 0 : index
    %c0_170 = arith.constant 0 : index
    %272 = vector.load %arg18[%c0_169, %c0_170] : memref<8x32xf32, #tpu.memory_space<vmem>>, vector<8x8xf32>
    tpu.vector_store %arg18[%c0_169, %c0_170], %271 {strides = array<i32>} : memref<8x32xf32, #tpu.memory_space<vmem>>, vector<8x8xf32>,
    %273 = vector.extract_strided_slice %269 {offsets = [1, 0, 0], sizes = [1, 8, 8], strides = [1, 1, 1]} : vector<4x8x8xf32> to vector<1x8x8xf32>
    %274 = vector.shape_cast %273 : vector<1x8x8xf32> to vector<8x8xf32>
    %c0_171 = arith.constant 0 : index
    %c8_172 = arith.constant 8 : index
    %275 = vector.load %arg18[%c0_171, %c8_172] : memref<8x32xf32, #tpu.memory_space<vmem>>, vector<8x8xf32>
    tpu.vector_store %arg18[%c0_171, %c8_172], %274 {strides = array<i32>} : memref<8x32xf32, #tpu.memory_space<vmem>>, vector<8x8xf32>,
    %276 = vector.extract_strided_slice %269 {offsets = [2, 0, 0], sizes = [1, 8, 8], strides = [1, 1, 1]} : vector<4x8x8xf32> to vector<1x8x8xf32>
    %277 = vector.shape_cast %276 : vector<1x8x8xf32> to vector<8x8xf32>
    %c0_173 = arith.constant 0 : index
    %c16_174 = arith.constant 16 : index
    %278 = vector.load %arg18[%c0_173, %c16_174] : memref<8x32xf32, #tpu.memory_space<vmem>>, vector<8x8xf32>
    tpu.vector_store %arg18[%c0_173, %c16_174], %277 {strides = array<i32>} : memref<8x32xf32, #tpu.memory_space<vmem>>, vector<8x8xf32>,
    %279 = vector.extract_strided_slice %269 {offsets = [3, 0, 0], sizes = [1, 8, 8], strides = [1, 1, 1]} : vector<4x8x8xf32> to vector<1x8x8xf32>
    %280 = vector.shape_cast %279 : vector<1x8x8xf32> to vector<8x8xf32>
    %c0_175 = arith.constant 0 : index
    %c24_176 = arith.constant 24 : index
    %281 = vector.load %arg18[%c0_175, %c24_176] : memref<8x32xf32, #tpu.memory_space<vmem>>, vector<8x8xf32>
    tpu.vector_store %arg18[%c0_175, %c24_176], %280 {strides = array<i32>} : memref<8x32xf32, #tpu.memory_space<vmem>>, vector<8x8xf32>,
    %c0_177 = arith.constant 0 : index
    %c0_178 = arith.constant 0 : index
    %282 = vector.load %arg18[%c0_177, %c0_178] : memref<8x32xf32, #tpu.memory_space<vmem>>, vector<8x32xf32>
    %c1_179 = arith.constant 1 : index
    %c0_180 = arith.constant 0 : index
    %c0_181 = arith.constant 0 : index
    %283 = vector.load %arg8[%c1_179, %c0_180, %c0_181] : memref<2x32x32xf32, #tpu.memory_space<vmem>>, vector<1x32x32xf32>
    %284 = vector.shape_cast %283 : vector<1x32x32xf32> to vector<32x32xf32>
    %cst_182 = arith.constant dense<0.000000e+00> : vector<8x32xf32>
    %285 = tpu.matmul %282, %284, %cst_182 {dimension_numbers = #tpu.dot_dimension_numbers<[1], [0], [0], [1], [0, 0, 1, 1], [], []>} : vector<8x32xf32>, vector<32x32xf32>, vector<8x32xf32> -> vector<8x32xf32>
    %c1_183 = arith.constant 1 : index
    %c0_184 = arith.constant 0 : index
    %c0_185 = arith.constant 0 : index
    %286 = vector.load %arg9[%c1_183, %c0_184, %c0_185] : memref<2x1x32xf32, #tpu.memory_space<vmem>>, vector<1x1x32xf32>
    %287 = vector.shape_cast %286 : vector<1x1x32xf32> to vector<1x32xf32>
    %288 = vector.broadcast %287 : vector<1x32xf32> to vector<8x32xf32>
    %289 = arith.addf %285, %288 : vector<8x32xf32>
    %290 = arith.addf %289, %191 : vector<8x32xf32>
    %291 = vector.extract_strided_slice %193 {offsets = [0, 0], sizes = [1, 32], strides = [1, 1]} : vector<2x32xf32> to vector<1x32xf32>
    %292 = vector.extract_strided_slice %195 {offsets = [0, 0], sizes = [1, 32], strides = [1, 1]} : vector<2x32xf32> to vector<1x32xf32>
    %cst_186 = arith.constant dense<0.000000e+00> : vector<8xf32>
    %293 = vector.multi_reduction <add>, %290, %cst_186 [1] : vector<8x32xf32> to vector<8xf32>
    %294 = vector.shape_cast %293 : vector<8xf32> to vector<8x1xf32>
    %cst_187 = arith.constant 3.200000e+01 : f32
    %295 = vector.broadcast %cst_187 : f32 to vector<8x1xf32>
    %296 = arith.divf %294, %295 : vector<8x1xf32>
    %297 = vector.broadcast %296 : vector<8x1xf32> to vector<8x32xf32>
    %298 = arith.subf %290, %297 : vector<8x32xf32>
    %299 = arith.mulf %298, %298 : vector<8x32xf32>
    %cst_188 = arith.constant dense<0.000000e+00> : vector<8xf32>
    %300 = vector.multi_reduction <add>, %299, %cst_188 [1] : vector<8x32xf32> to vector<8xf32>
    %301 = vector.shape_cast %300 : vector<8xf32> to vector<8x1xf32>
    %cst_189 = arith.constant 3.200000e+01 : f32
    %302 = vector.broadcast %cst_189 : f32 to vector<8x1xf32>
    %303 = arith.divf %301, %302 : vector<8x1xf32>
    %304 = vector.broadcast %296 : vector<8x1xf32> to vector<8x32xf32>
    %305 = arith.subf %290, %304 : vector<8x32xf32>
    %cst_190 = arith.constant 9.99999997E-7 : f32
    %306 = vector.broadcast %cst_190 : f32 to vector<8x1xf32>
    %307 = arith.addf %303, %306 : vector<8x1xf32>
    %308 = math.rsqrt %307 : vector<8x1xf32>
    %309 = vector.broadcast %308 : vector<8x1xf32> to vector<8x32xf32>
    %310 = arith.mulf %305, %309 : vector<8x32xf32>
    %311 = vector.broadcast %291 : vector<1x32xf32> to vector<8x32xf32>
    %312 = arith.mulf %310, %311 : vector<8x32xf32>
    %313 = vector.broadcast %292 : vector<1x32xf32> to vector<8x32xf32>
    %314 = arith.addf %312, %313 : vector<8x32xf32>
    %c1_191 = arith.constant 1 : index
    %c0_192 = arith.constant 0 : index
    %c0_193 = arith.constant 0 : index
    %315 = vector.load %arg12[%c1_191, %c0_192, %c0_193] : memref<2x32x64xf32, #tpu.memory_space<vmem>>, vector<1x32x64xf32>
    %316 = vector.shape_cast %315 : vector<1x32x64xf32> to vector<32x64xf32>
    %cst_194 = arith.constant dense<0.000000e+00> : vector<8x64xf32>
    %317 = tpu.matmul %314, %316, %cst_194 {dimension_numbers = #tpu.dot_dimension_numbers<[1], [0], [0], [1], [0, 0, 1, 1], [], []>} : vector<8x32xf32>, vector<32x64xf32>, vector<8x64xf32> -> vector<8x64xf32>
    %c1_195 = arith.constant 1 : index
    %c0_196 = arith.constant 0 : index
    %c0_197 = arith.constant 0 : index
    %318 = vector.load %arg13[%c1_195, %c0_196, %c0_197] : memref<2x1x64xf32, #tpu.memory_space<vmem>>, vector<1x1x64xf32>
    %319 = vector.shape_cast %318 : vector<1x1x64xf32> to vector<1x64xf32>
    %320 = vector.broadcast %319 : vector<1x64xf32> to vector<8x64xf32>
    %321 = arith.addf %317, %320 : vector<8x64xf32>
    %cst_198 = arith.constant 0.000000e+00 : f32
    %322 = vector.broadcast %cst_198 : f32 to vector<8x64xf32>
    %323 = arith.maximumf %321, %322 : vector<8x64xf32>
    %c1_199 = arith.constant 1 : index
    %c0_200 = arith.constant 0 : index
    %c0_201 = arith.constant 0 : index
    %324 = vector.load %arg14[%c1_199, %c0_200, %c0_201] : memref<2x64x32xf32, #tpu.memory_space<vmem>>, vector<1x64x32xf32>
    %325 = vector.shape_cast %324 : vector<1x64x32xf32> to vector<64x32xf32>
    %cst_202 = arith.constant dense<0.000000e+00> : vector<8x32xf32>
    %326 = tpu.matmul %323, %325, %cst_202 {dimension_numbers = #tpu.dot_dimension_numbers<[1], [0], [0], [1], [0, 0, 1, 1], [], []>} : vector<8x64xf32>, vector<64x32xf32>, vector<8x32xf32> -> vector<8x32xf32>
    %c1_203 = arith.constant 1 : index
    %c0_204 = arith.constant 0 : index
    %c0_205 = arith.constant 0 : index
    %327 = vector.load %arg15[%c1_203, %c0_204, %c0_205] : memref<2x1x32xf32, #tpu.memory_space<vmem>>, vector<1x1x32xf32>
    %328 = vector.shape_cast %327 : vector<1x1x32xf32> to vector<1x32xf32>
    %329 = vector.broadcast %328 : vector<1x32xf32> to vector<8x32xf32>
    %330 = arith.addf %326, %329 : vector<8x32xf32>
    %331 = arith.addf %330, %314 : vector<8x32xf32>
    %332 = vector.extract_strided_slice %193 {offsets = [1, 0], sizes = [1, 32], strides = [1, 1]} : vector<2x32xf32> to vector<1x32xf32>
    %333 = vector.extract_strided_slice %195 {offsets = [1, 0], sizes = [1, 32], strides = [1, 1]} : vector<2x32xf32> to vector<1x32xf32>
    %cst_206 = arith.constant dense<0.000000e+00> : vector<8xf32>
    %334 = vector.multi_reduction <add>, %331, %cst_206 [1] : vector<8x32xf32> to vector<8xf32>
    %335 = vector.shape_cast %334 : vector<8xf32> to vector<8x1xf32>
    %cst_207 = arith.constant 3.200000e+01 : f32
    %336 = vector.broadcast %cst_207 : f32 to vector<8x1xf32>
    %337 = arith.divf %335, %336 : vector<8x1xf32>
    %338 = vector.broadcast %337 : vector<8x1xf32> to vector<8x32xf32>
    %339 = arith.subf %331, %338 : vector<8x32xf32>
    %340 = arith.mulf %339, %339 : vector<8x32xf32>
    %cst_208 = arith.constant dense<0.000000e+00> : vector<8xf32>
    %341 = vector.multi_reduction <add>, %340, %cst_208 [1] : vector<8x32xf32> to vector<8xf32>
    %342 = vector.shape_cast %341 : vector<8xf32> to vector<8x1xf32>
    %cst_209 = arith.constant 3.200000e+01 : f32
    %343 = vector.broadcast %cst_209 : f32 to vector<8x1xf32>
    %344 = arith.divf %342, %343 : vector<8x1xf32>
    %345 = vector.broadcast %337 : vector<8x1xf32> to vector<8x32xf32>
    %346 = arith.subf %331, %345 : vector<8x32xf32>
    %cst_210 = arith.constant 9.99999997E-7 : f32
    %347 = vector.broadcast %cst_210 : f32 to vector<8x1xf32>
    %348 = arith.addf %344, %347 : vector<8x1xf32>
    %349 = math.rsqrt %348 : vector<8x1xf32>
    %350 = vector.broadcast %349 : vector<8x1xf32> to vector<8x32xf32>
    %351 = arith.mulf %346, %350 : vector<8x32xf32>
    %352 = vector.broadcast %332 : vector<1x32xf32> to vector<8x32xf32>
    %353 = arith.mulf %351, %352 : vector<8x32xf32>
    %354 = vector.broadcast %333 : vector<1x32xf32> to vector<8x32xf32>
    %355 = arith.addf %353, %354 : vector<8x32xf32>
    %c0_211 = arith.constant 0 : index
    %c0_212 = arith.constant 0 : index
    %356 = vector.load %arg16[%c0_211, %c0_212] : memref<8x32xf32, #tpu.memory_space<vmem>>, vector<8x32xf32>
    tpu.vector_store %arg16[%c0_211, %c0_212], %355 {strides = array<i32>} : memref<8x32xf32, #tpu.memory_space<vmem>>, vector<8x32xf32>,
    return
  }
  func.func @transform_0(%arg0: i32) -> (i32, i32) {
    %c0_i32 = arith.constant 0 : i32
    %c0_i32_0 = arith.constant 0 : i32
    return %arg0, %c0_i32 : i32, i32
  }
  func.func @transform_1(%arg0: i32) -> (i32, i32) {
    %c0_i32 = arith.constant 0 : i32
    %c0_i32_0 = arith.constant 0 : i32
    %c0_i32_1 = arith.constant 0 : i32
    return %c0_i32, %c0_i32_0 : i32, i32
  }
  func.func @transform_2(%arg0: i32) -> (i32, i32) {
    %c0_i32 = arith.constant 0 : i32
    %c0_i32_0 = arith.constant 0 : i32
    %c0_i32_1 = arith.constant 0 : i32
    return %c0_i32, %c0_i32_0 : i32, i32
  }
  func.func @transform_3(%arg0: i32) -> (i32, i32) {
    %c0_i32 = arith.constant 0 : i32
    %c0_i32_0 = arith.constant 0 : i32
    %c0_i32_1 = arith.constant 0 : i32
    return %c0_i32, %c0_i32_0 : i32, i32
  }
  func.func @transform_4(%arg0: i32) -> (i32, i32, i32) {
    %c0_i32 = arith.constant 0 : i32
    %c0_i32_0 = arith.constant 0 : i32
    %c0_i32_1 = arith.constant 0 : i32
    return %arg0, %c0_i32, %c0_i32_0 : i32, i32, i32
  }
  func.func @transform_5(%arg0: i32) -> (i32, i32, i32) {
    %c0_i32 = arith.constant 0 : i32
    %c0_i32_0 = arith.constant 0 : i32
    %c0_i32_1 = arith.constant 0 : i32
    %c0_i32_2 = arith.constant 0 : i32
    return %c0_i32, %c0_i32_0, %c0_i32_1 : i32, i32, i32
  }
  func.func @transform_6(%arg0: i32) -> (i32, i32, i32) {
    %c0_i32 = arith.constant 0 : i32
    %c0_i32_0 = arith.constant 0 : i32
    %c0_i32_1 = arith.constant 0 : i32
    %c0_i32_2 = arith.constant 0 : i32
    return %c0_i32, %c0_i32_0, %c0_i32_1 : i32, i32, i32
  }
  func.func @transform_7(%arg0: i32) -> (i32, i32, i32) {
    %c0_i32 = arith.constant 0 : i32
    %c0_i32_0 = arith.constant 0 : i32
    %c0_i32_1 = arith.constant 0 : i32
    %c0_i32_2 = arith.constant 0 : i32
    return %c0_i32, %c0_i32_0, %c0_i32_1 : i32, i32, i32
  }
  func.func @transform_8(%arg0: i32) -> (i32, i32, i32) {
    %c0_i32 = arith.constant 0 : i32
    %c0_i32_0 = arith.constant 0 : i32
    %c0_i32_1 = arith.constant 0 : i32
    %c0_i32_2 = arith.constant 0 : i32
    return %c0_i32, %c0_i32_0, %c0_i32_1 : i32, i32, i32
  }
  func.func @transform_9(%arg0: i32) -> (i32, i32, i32) {
    %c0_i32 = arith.constant 0 : i32
    %c0_i32_0 = arith.constant 0 : i32
    %c0_i32_1 = arith.constant 0 : i32
    %c0_i32_2 = arith.constant 0 : i32
    return %c0_i32, %c0_i32_0, %c0_i32_1 : i32, i32, i32
  }
  func.func @transform_10(%arg0: i32) -> (i32, i32, i32) {
    %c0_i32 = arith.constant 0 : i32
    %c0_i32_0 = arith.constant 0 : i32
    %c0_i32_1 = arith.constant 0 : i32
    %c0_i32_2 = arith.constant 0 : i32
    return %c0_i32, %c0_i32_0, %c0_i32_1 : i32, i32, i32
  }
  func.func @transform_11(%arg0: i32) -> (i32, i32, i32) {
    %c0_i32 = arith.constant 0 : i32
    %c0_i32_0 = arith.constant 0 : i32
    %c0_i32_1 = arith.constant 0 : i32
    %c0_i32_2 = arith.constant 0 : i32
    return %c0_i32, %c0_i32_0, %c0_i32_1 : i32, i32, i32
  }
  func.func @transform_12(%arg0: i32) -> (i32, i32, i32) {
    %c0_i32 = arith.constant 0 : i32
    %c0_i32_0 = arith.constant 0 : i32
    %c0_i32_1 = arith.constant 0 : i32
    %c0_i32_2 = arith.constant 0 : i32
    return %c0_i32, %c0_i32_0, %c0_i32_1 : i32, i32, i32
  }
  func.func @transform_13(%arg0: i32) -> (i32, i32, i32) {
    %c0_i32 = arith.constant 0 : i32
    %c0_i32_0 = arith.constant 0 : i32
    %c0_i32_1 = arith.constant 0 : i32
    %c0_i32_2 = arith.constant 0 : i32
    return %c0_i32, %c0_i32_0, %c0_i32_1 : i32, i32, i32
  }
  func.func @transform_14(%arg0: i32) -> (i32, i32, i32) {
    %c0_i32 = arith.constant 0 : i32
    %c0_i32_0 = arith.constant 0 : i32
    %c0_i32_1 = arith.constant 0 : i32
    %c0_i32_2 = arith.constant 0 : i32
    return %c0_i32, %c0_i32_0, %c0_i32_1 : i32, i32, i32
  }
  func.func @transform_15(%arg0: i32) -> (i32, i32) {
    %c0_i32 = arith.constant 0 : i32
    %c0_i32_0 = arith.constant 0 : i32
    return %arg0, %c0_i32 : i32, i32
  }
}

</mosaic_0001>

<bundles_post_ra>
// kernel: tpu_custom_call.1
= control target key start
LH: loop header
LB: loop body
LE: loop exit
PB: predicated region body
PF: predicated region fallthrough
CT: control target
= control target key end

     0   :  { %s4498_s0 = inlined_call_operand.hbm [shape: f32[16,32], index: 0, kind: input, shape index: {}]   ;;  %s4499_s1 = inlined_call_operand.hbm [shape: f32[8,32], index: 1, kind: input, shape index: {}]   ;;  %s4500_s2 = inlined_call_operand.hbm [shape: f32[1,32], index: 2, kind: input, shape index: {}]   ;;  %s4501_s3 = inlined_call_operand.hbm [shape: f32[1,32], index: 3, kind: input, shape index: {}]   ;;  %s4502_s4 = inlined_call_operand.vmem [shape: f32[2,1,8], index: 4, kind: input, shape index: {}]   ;;  %s4503_s5 = inlined_call_operand.vmem [shape: f32[2,32,96], index: 5, kind: input, shape index: {}]   ;;  %s4504_s6 = inlined_call_operand.vmem [shape: f32[2,1,96], index: 6, kind: input, shape index: {}]   ;;  %s4505_s7 = inlined_call_operand.vmem [shape: f32[2,32,32], index: 7, kind: input, shape index: {}]   ;;  %s4506_s8 = inlined_call_operand.vmem [shape: f32[2,1,32], index: 8, kind: input, shape index: {}]   ;;  %s4507_s9 = inlined_call_operand.vmem [shape: f32[2,2,32], index: 9, kind: input, shape index: {}]   ;;  %s4508_s10 = inlined_call_operand.vmem [shape: f32[2,2,32], index: 10, kind: input, shape index: {}]   ;;  %s4509_s11 = inlined_call_operand.vmem [shape: f32[2,32,64], index: 11, kind: input, shape index: {}]   ;;  %s4510_s12 = inlined_call_operand.vmem [shape: f32[2,1,64], index: 12, kind: input, shape index: {}]   ;;  %s4511_s13 = inlined_call_operand.vmem [shape: f32[2,64,32], index: 13, kind: input, shape index: {}]   ;;  %s4512_s14 = inlined_call_operand.vmem [shape: f32[2,1,32], index: 14, kind: input, shape index: {}]   ;;  %s4513_s15 = inlined_call_operand.hbm [shape: f32[16,32], index: 15, kind: output, shape index: {}]  }
   0x1   :  { %4539 = sst [smem:[#allocation19_spill]] %s4498_s0 }
   0x2   :  { %4540 = sst [smem:[#allocation20_spill]] %s4499_s1 }
   0x3   :  { %4541 = sst [smem:[#allocation21_spill]] %s4500_s2 }
   0x4   :  { %4542 = sst [smem:[#allocation22_spill]] %s4507_s9 }
   0x5   :  { %4543 = sst [smem:[#allocation23_spill]] %s4508_s10 }
   0x6   :  { %4544 = sst [smem:[#allocation24_spill]] %s4510_s12 }
   0x7   :  { %4545 = sst [smem:[#allocation25_spill]] %s4512_s14 }
   0x8   :  { %4546 = sst [smem:[#allocation26_spill]] %s4513_s15 }
   0x9   :  { %20 = vsyncpa [#allocation5], 0 }
   0xa   :  { %22 = vsyncpa [#allocation5 + $0x1], 0 }
   0xb   :  { %23 = vsyncpa [#allocation8], 0 }
   0xc   :  { %24 = vsyncpa [#allocation11], 0 }
   0xd   :  { %25 = vsyncpa [#allocation6], 0 }
   0xe   :  { %27 = vsyncpa [#allocation6 + $0x1], 0  ;;  %s3819_s18 = smov 0   ;;  %s3821_s19 = smov 0  }
   0xf   :  { %s3823_s20 = smov 0   ;;  %s3825_s21 = smov 0  }
  0x10 LB: > { %4547 = sst [smem:[#allocation17_spill]] %s3703_s18  ;;  %s3840_s22 = sadd.s32 4294967295, %s3715_s21   ;;  %s3715_s21 = sphi %s3825_s21, %s4593_s21   ;;  %s3711_s20 = sphi %s3823_s20, %s4592_s20   ;;  %s3707_s19 = sphi %s3821_s19, %s4591_s19   ;;  %s3703_s18 = sphi %s3819_s18, %s4590_s18  }
  0x11   : > { %s2980_s23 = sadd.s32 4294967294, %s3715_s21   ;;  %p53_p0 = scmp.ne.s32.totalorder %s3707_s19, %s3703_s18 }
  0x12   : > { %p4519_p1 = scmp.eq.s32.totalorder %s3840_s22, 0  ;;  %p382_p3 = scmp.eq.s32.totalorder %s2980_s23, 1 }
  0x13   : > { %p2981_p5 = scmp.ge.s32.totalorder %s3715_s21, 1  ;;  %p389_p7 = scmp.lt.s32.totalorder %s3715_s21, 3 }
  0x14   : > { %p3849_p4 = por %p4519_p1, %p53_p0  ;;  %p3854_p6 = por %p382_p3, %p53_p0 }
  0x15   : > { %p3859_p8 = pnand %p2981_p5, %p389_p7  ;;  %s3717_s27 = smov [#allocation7]  }
  0x16   : > { %s4548_s24 = scalar_select %p3849_p4, 1, 0 }
  0x17   : > { %s4549_s25 = scalar_select %p3854_p6, 1, 0 }
  0x18   : > { %s4551_s26 = scalar_select %p3859_p8, 1, 0 }
  0x19   : > { %4550 = sst [smem:[#allocation18_spill]] %s4549_s25  ;;  %s402_s28 = sshll.u32 %s3717_s27, 4  ;;  %s403_s28 = int_to_ptr.vmem [resolvable:$true] %s402_s28 }
  0x1a   : > { %p3407_p10 = pneg %p3859_p8  ;;  %s3718_s29 = smov [#allocation9]  }
  0x1b   : > { %s413_s30 = sshll.u32 %s3718_s29, 4  ;;  %s3719_s17 = smov [#allocation10]   ;;  %s3872_s30 = int_to_ptr.vmem [resolvable:$true] %s413_s30 }
  0x1c   : > { %p3868_p11 = pnand %p3407_p10, %p4519_p1  ;;  %s424_s23 = sshll.u32 %s3719_s17, 4  ;;  %s3874_s23 = int_to_ptr.vmem [resolvable:$true] %s424_s23 }
  0x1d   : > { %s4553_s1 = sld [smem:[#allocation20_spill]] }
  0x1e   : > { %p3884_p13 = pneg %p3868_p11 }
  0x23   : > { %s3527_s18 = scalar_lea.hbm %s4553_s1, 128 }
  0x24   : > { %p3528_p12 = scmp.ne.s32.totalorder %s4553_s1, %s3527_s18  ;;  %p3534_p5 = scmp.lt.u32.totalorder %s3527_s18, %s4553_s1 }
  0x26   : > { %p3530_p0 = pnand %p3884_p13, %p3528_p12 }
  0x28   : > { %p3531_p3 = pneg %p3530_p0 }
  0x2a   : > { %p3536_p7 = pnand %p3534_p5, %p3531_p3 }
  0x2c   : > { %3539 = shalt.err (!%p3536_p7)
}
  0x2d   : > { %s3540_s25 = scalar_lea.vmem %s403_s28, 128  ;;  %p3548_p2 = scmp.lt.s32.totalorder %s403_s28, %s403_s28 }
  0x2e   : > { %p3541_p10 = scmp.ne.s32.totalorder %s403_s28, %s3540_s25  ;;  %p3549_p6 = scmp.lt.s32.totalorder %s3540_s25, %s3540_s25 }
  0x30   : > { %p3543_p9 = pnand %p3541_p10, %p3884_p13  ;;  %p3550_p4 = por %p3549_p6, %p3548_p2 }
  0x32   : > { %p3544_p1 = pneg %p3543_p9 }
  0x34   : > { %p3551_p8 = pnand %p3550_p4, %p3544_p1 }
  0x36   : > { %3554 = shalt.err (!%p3551_p8)
}
  0x37   : > { %3410 = dma.hbm_to_vmem [thread:$0]  (!%p3868_p11), %s4553_s1, 128, %s403_s28, [#allocation8]  }
  0x38   : > { %s4555_s2 = sld [smem:[#allocation21_spill]] }
  0x3e   : > { %s3555_s27 = scalar_lea.hbm %s4555_s2, 16 }
  0x3f   : > { %p3556_p9 = scmp.ne.s32.totalorder %s4555_s2, %s3555_s27  ;;  %p3562_p1 = scmp.lt.u32.totalorder %s3555_s27, %s4555_s2 }
  0x41   : > { %p3558_p12 = pnand %p3556_p9, %p3884_p13 }
  0x43   : > { %p3559_p2 = pneg %p3558_p12 }
  0x45   : > { %p3564_p4 = pnand %p3562_p1, %p3559_p2 }
  0x47   : > { %3567 = shalt.err (!%p3564_p4)
}
  0x48   : > { %s3568_s28 = scalar_lea.vmem %s3872_s30, 16  ;;  %s3575_s10 = scalar_lea.vmem %s3872_s30, 32 }
  0x49   : > { %p3569_p6 = scmp.ne.s32.totalorder %s3872_s30, %s3568_s28  ;;  %p3576_p3 = scmp.lt.s32.totalorder %s3872_s30, %s3872_s30 }
  0x4a   : > { %p3577_p5 = scmp.lt.s32.totalorder %s3575_s10, %s3568_s28 }
  0x4b   : > { %p3571_p8 = pnand %p3569_p6, %p3884_p13 }
  0x4c   : > { %p3578_p7 = por %p3577_p5, %p3576_p3 }
  0x4d   : > { %p3572_p0 = pneg %p3571_p8 }
  0x4f   : > { %p3579_p10 = pnand %p3578_p7, %p3572_p0 }
  0x51   : > { %3582 = shalt.err (!%p3579_p10)
}
  0x52   : > { %3413 = dma.hbm_to_vmem [thread:$0]  (!%p3868_p11), %s4555_s2, 16, %s3872_s30, [#allocation8]  }
  0x53   : > { %s3583_s18 = scalar_lea.hbm %s4501_s3, 16 }
  0x54   : > { %p3584_p9 = scmp.ne.s32.totalorder %s4501_s3, %s3583_s18  ;;  %p3590_p1 = scmp.lt.u32.totalorder %s3583_s18, %s4501_s3 }
  0x56   : > { %p3586_p12 = pnand %p3584_p9, %p3884_p13 }
  0x58   : > { %p3587_p2 = pneg %p3586_p12 }
  0x5a   : > { %p3592_p4 = pnand %p3590_p1, %p3587_p2 }
  0x5c   : > { %3595 = shalt.err (!%p3592_p4)
}
  0x5d   : > { %s3596_s30 = scalar_lea.vmem %s3874_s23, 16  ;;  %s3603_s10 = scalar_lea.vmem %s3874_s23, 32 }
  0x5e   : > { %p3597_p6 = scmp.ne.s32.totalorder %s3874_s23, %s3596_s30  ;;  %p3604_p3 = scmp.lt.s32.totalorder %s3874_s23, %s3874_s23 }
  0x5f   : > { %p3605_p5 = scmp.lt.s32.totalorder %s3603_s10, %s3596_s30 }
  0x60   : > { %p3599_p8 = pnand %p3597_p6, %p3884_p13 }
  0x61   : > { %p3606_p7 = por %p3605_p5, %p3604_p3 }
  0x62   : > { %p3600_p0 = pneg %p3599_p8 }
  0x64   : > { %p3607_p10 = pnand %p3606_p7, %p3600_p0 }
  0x66   : > { %3610 = shalt.err (!%p3607_p10)
}
  0x67   : > { %3416 = dma.hbm_to_vmem [thread:$0]  (!%p3868_p11), %s4501_s3, 16, %s3874_s23, [#allocation11]  }
  0x68   : > { %s3949_s29 = sadd.s32 1, %s3715_s21   ;;  %s40_s15 = sadd.s32 1, %s3711_s20 }
  0x69   : > { %s37_s16 = ssub.s32 %s3715_s21, %s3949_s29  ;;  %p47_p9 = scmp.ne.s32.totalorder %s3711_s20, %s3707_s19 }
  0x6a   : > { %p38_p13 = scmp.eq.s32.totalorder %s37_s16, 0  ;;  %p48_p12 = scmp.eq.s32.totalorder %s3715_s21, 0 }
  0x6b   : > { %p3428_p2 = scmp.lt.s32.totalorder %s3715_s21, 2  ;;  %p4556_p4 = scmp.eq.s32.totalorder %s3840_s22, 1 }
  0x6c   : > { %s3959_s12 = scalar_select %p38_p13, %s3711_s20, %s40_s15  }
  0x6d   : > { %p49_p1 = por %p48_p12, %p47_p9  ;;  %p3963_p6 = por %p4556_p4, %p47_p9 }
  0x6e   : > { %s465_s27 = sand.u32 1, %s3711_s20   ;;  %s2987_s17 = sshll.u32 %s3715_s21, 7 }
  0x6f   : > { %s2986_s23 = sshll.u32 %s465_s27, 3  ;;  %s4558_s0 = sld [smem:[#allocation19_spill]] }
  0x70   : > { %s469_s10 = scalar_lea.vmem [#allocation4], %s2986_s23  ;;  %p3974_p11 = pnand %p3428_p2, %p49_p1 }
  0x71   : > { %s476_s9 = sshll.u32 %s469_s10, 4  ;;  %s466_s16 = scalar_lea.sflag [#allocation5], %s465_s27  ;;  %s3978_s9 = int_to_ptr.vmem [resolvable:$true] %s476_s9 }
  0x72   : > { %p3613_p0 = pneg %p3974_p11 }
  0x75   : > { %s3972_s30 = scalar_lea.hbm %s4558_s0, %s2987_s17  ;;  %s3616_s25 = scalar_lea.hbm %s4558_s0, 256 }
  0x76   : > { %s3611_s15 = scalar_lea.hbm %s3972_s30, 128  ;;  %p3617_p7 = scmp.lt.u32.totalorder %s3972_s30, %s4558_s0 }
  0x77   : > { %p3612_p8 = scmp.ne.s32.totalorder %s3972_s30, %s3611_s15  ;;  %p3618_p10 = scmp.lt.u32.totalorder %s3616_s25, %s3611_s15 }
  0x78   : > { %p3620_p9 = scmp.lt.u32.totalorder %s3611_s15, %s3972_s30 }
  0x79   : > { %p3614_p3 = pnand %p3613_p0, %p3612_p8  ;;  %p3619_p13 = por %p3618_p10, %p3617_p7 }
  0x7b   : > { %p3615_p5 = pneg %p3614_p3  ;;  %p3621_p12 = por %p3620_p9, %p3619_p13 }
  0x7d   : > { %p3622_p2 = pnand %p3621_p12, %p3615_p5 }
  0x7f   : > { %3625 = shalt.err (!%p3622_p2)
}
  0x80   : > { %s3626_s27 = scalar_lea.vmem %s3978_s9, 128  ;;  %s3720_s17 = smov [#allocation4]  }
  0x81   : > { %p3627_p1 = scmp.ne.s32.totalorder %s3978_s9, %s3626_s27  ;;  %s3631_s23 = sshll.u32 %s3720_s17, 4  ;;  %s3632_s23 = int_to_ptr.vmem [resolvable:$false] %s3631_s23 }
  0x82   : > { %s3633_s28 = scalar_lea.vmem %s3632_s23, 256  ;;  %p3634_p3 = scmp.lt.s32.totalorder %s3978_s9, %s3632_s23 }
  0x83   : > { %p3629_p4 = pnand %p3627_p1, %p3613_p0  ;;  %p3635_p7 = scmp.lt.s32.totalorder %s3633_s28, %s3626_s27 }
  0x85   : > { %p3630_p8 = pneg %p3629_p4  ;;  %p3636_p10 = por %p3635_p7, %p3634_p3 }
  0x87   : > { %p3637_p13 = pnand %p3636_p10, %p3630_p8 }
  0x89   : > { %3640 = shalt.err (!%p3637_p13)
}
  0x8a   : > { %3420 = dma.hbm_to_vmem [thread:$0]  (!%p3974_p11), %s3972_s30, 128, %s3978_s9, %s466_s16  }
  0x8b   : > { %p4560_p5 = scmp.ne.s32.totalorder %s4551_s26, 0 }
  0x8c   : > { %s4008_s15 = sand.u32 (!%p4560_p5), 1, %s3707_s19   ;;  %p4561_p0 = scmp.ne.s32.totalorder (!%p4560_p5), %s4548_s24, 0 }
  0x8d   : > { %491 = sbr.rel (%p4560_p5) target bundleno = 5478 (0x1566), region = 80  ;;  %s4524_s25 = sshll.u32 (!%p4560_p5), %s4008_s15, 3 }
  0x8e   : > { %s494_s10 = scalar_lea.sflag (!%p4560_p5), [#allocation5], %s4008_s15  ;;  %s497_s27 = scalar_lea.vmem (!%p4560_p5), [#allocation4], %s4524_s25 }
  0x94   : > { %3686 = dma.done.wait (%p4561_p0), %s494_s10, 128  }
  0x95   : > { %3688 = vsyncadd (%p4561_p0), %s494_s10, 4294967168  ;;  %p4562_p11 = scmp.eq.s32.totalorder %s3840_s22, 0 }
  0x97   : > { %3690 = dma.done.wait (%p4562_p11), [#allocation8], 144   ;;  %p4563_p9 = pmov %p4562_p11 }
  0x99   : > { %3692 = vsyncadd (%p4563_p9), [#allocation8], 4294967152  ;;  %p4564_p12 = pmov %p4563_p9 }
  0x9a   : > { %p4565_p2 = pmov %p4563_p9 }
  0x9b   : > { %3694 = dma.done.wait (%p4564_p12), [#allocation11], 16  }
  0x9c   : > { %3696 = vsyncadd (%p4565_p2), [#allocation11], 4294967280  ;;  %v562_v0 = vld [vmem:[%s497_s27] sm:$0xff]  ;;  %v563_v1 = vld [vmem:[#allocation7] sm:$0xff]  ;;  %vm567_vm0 = vcmask 261120   ;;  %v3721_v12 = vmov 0.0|0.0  }
  0x9d   : > { %v564_v2 = vadd.f32 %v563_v1, %v562_v0  ;;  %v599_v9 = vld [vmem:[%s4503_s5] sm:$0xff]  ;;  %v600_v10 = vld [vmem:[%s4503_s5 + $0x8] sm:$0xff]  ;;  %v601_v11 = vld [vmem:[%s4503_s5 + $0x10] sm:$0xff]  ;;  %3331 = vmatprep.subr.bf16.mxu1 %v3721_v12  ;;  %vm3722_vm1 = vmmov 0   ;;  %v3723_v15 = vmov 0.0   ;;  %vm683_vm2 = vcmask 64512  }
  0x9e   : > { %v3332_v13 = vpack.c.bf16 %v600_v10, %v599_v9  ;;  %v602_v14 = vld [vmem:[%s4503_s5 + $0x18] sm:$0xff]  ;;  %3155 = vmatprep.mubr.msk.f32.mxu1 %vm3722_vm1, %v3723_v15  ;;  %3168 = vmatprep.subr.mxu0 %v3723_v15  ;;  %v2994_v21 = vld [vmem:[#allocation9] ss:$0 sm:$0xff]  ;;  %v2995_v23 = vld [vmem:[#allocation10] ss:$0 sm:$0xff]  ;;  %s4536_s27 = smov 120  }
  0x9f   : > { %v568_v3 = vsel %vm567_vm0, %v564_v2, 0.0  ;;  %3170 = vmatprep.mubr.msk.f32.mxu0 %vm3722_vm1, %v3723_v15  ;;  %v3335_v16 = vpack.c.bf16 %v602_v14, %v601_v11  ;;  %v2996_v26 = vld [vmem:[%s4504_s6] ss:$0 sm:$0xff]  ;;  %s4537_s24 = smov 96   ;;  %s4538_s26 = smov 88   ;;  %vm1412_vm3 = vcmask 130112  }
  0xa0   : > { %569 = vadd.xlane.f32.xlu0 %v568_v3  ;;  %3333 = vmatpush3.bf16.msra.mxu1 %v3332_v13  ;;  %s4535_s30 = smov 80   ;;  %s4531_s9 = smov 72   ;;  %vm1418_vm4 = vcmask 195712   ;;  %vm1424_vm5 = vcmask 261312   ;;  %vm1635_vm6 = vcmask 523264  }
  0xa1   : > { %3334 = vmatprep.subr.bf16.mxu1 %v3721_v12  ;;  %s4530_s14 = smov 112   ;;  %s4529_s16 = smov 104  }
  0xa2   : > { %p559_p1 = scmp.lt.s32.totalorder %s3840_s22, 1  ;;  %s4527_s23 = smov 48  }
  0xa3   : > { %s4526_s28 = smov 40   ;;  %s4534_s25 = smov 16  }
  0xa4   : > { %3336 = vmatpush3.bf16.msra.mxu1 %v3335_v16  ;;  %s560_s17 = scalar_select %p559_p1, %s3840_s22, 1 }
  0xa5   : > { %3158 = vmatprep.subr.mxu1 %v3723_v15  ;;  %s2859_s0 = scalar_lea.sflag [#allocation6], %s4008_s15 }
  0xa6   : > { %s561_s10 = scalar_lea.vmem %s4502_s4, %s560_s17  ;;  %s4528_s17 = smov 64  }
  0xa7   : > { %v4107_v46 = vld [vmem:[%s561_s10] ss:$0 sm:$0xff]  ;;  %s4525_s10 = smov 56  }
 0x12d   : > { %v570_v4 = vpop.xlane.xlu0 %569 }
 0x12e   : > { %v572_v5 = vmul.f32 0.03125, %v570_v4 }
 0x130   : > { %v573_v6 = vsub.f32 %v564_v2, %v572_v5 }
 0x132   : > { %v574_v7 = vmul.f32 %v573_v6, %v573_v6 }
 0x134   : > { %v575_v8 = vsel %vm567_vm0, %v574_v7, 0.0 }
 0x135   : > { %576 = vadd.xlane.f32.xlu0 %v575_v8 }
 0x1c2   : > { %v577_v17 = vpop.xlane.xlu0 %576 }
 0x1c3   : > { %v578_v18 = vmul.f32 0.03125, %v577_v17 }
 0x1c5   : > { %v579_v19 = vadd.f32 1e-06, %v578_v18 }
 0x1c7   : > { %3485 = vrsqrt.f32 %v579_v19 }
 0x1d1   : > { %v3486_v20 = vpop.eup %3485 }
 0x1d2   : > { %v581_v22 = vmul.f32 %v3486_v20, %v573_v6 }
 0x1d4   : > { %v588_v24 = vmul.f32 %v2994_v21, %v581_v22 }
 0x1d6   : > { %v4048_v25 = vadd.f32 %v2995_v23, %v588_v24 }
 0x1d8   : > { %3156 = vmatmul.mubr.msk.f32.vlgmr.msra.gmra.mrb[0].mxu1 %vm567_vm0, %v4048_v25 }
 0x1d9   : > { %3160 = vmatprep.mubr.msk.f32.mxu1 %vm3722_vm1, %v3723_v15 }
 0x2ab   : > { %v679_v27 = vpop.f32.mrb[0].mxu1 }
 0x2ac   : > { %v4057_v28 = vadd.f32 %v2996_v26, %v679_v27  ;;  %v3157_v29 = vpop.f32.mrb[1].mxu1 }
 0x2ae   : > { %686 = vrot.lane.b32.xlu0 %v4057_v28, %s4536_s27  ;;  %701 = vrot.lane.b32.xlu1 %v4057_v28, %s4537_s24  ;;  %684 = vst.msk [vmem:[#allocation2] sm:$0xff] %vm683_vm2, %v4057_v28  ;;  %s4572_s27 = smov 120   ;;  %s4576_s24 = smov 104  }
 0x2b2   : > { %706 = vrot.lane.b32.xlu1 %v4057_v28, %s4538_s26  ;;  %s4577_s26 = smov 64  }
 0x2b5   : > { %v741_v35 = vld [vmem:[#allocation2] sm:$0xff] }
 0x2b6   : > { %711 = vrot.lane.b32.xlu1 %v4057_v28, %s4535_s30  ;;  %s4573_s30 = smov 80  }
 0x2ba   : > { %716 = vrot.lane.b32.xlu1 %v4057_v28, %s4531_s9  ;;  %s4532_s9 = smov 24  }
 0x2be   : > { %691 = vrot.lane.b32.xlu1 %v4057_v28, %s4530_s14  ;;  %s4568_s14 = sld [smem:[#allocation24_spill]] }
 0x2c2   : > { %696 = vrot.lane.b32.xlu1 %v4057_v28, %s4529_s16  ;;  %s4569_s16 = sld [smem:[#allocation25_spill]] }
 0x320   : > { %v687_v30 = vpop.permute.xlu0 %686  ;;  %v702_v31 = vpop.permute.xlu1 %701 }
 0x321   : > { %690 = vst.msk [vmem:[#allocation2 + $0x8] sm:$0xff] %vm683_vm2, %v687_v30  ;;  %705 = vst.msk [vmem:[#allocation2 + $0x20] sm:$0xff] %vm683_vm2, %v702_v31 }
 0x324   : > { %v707_v32 = vpop.permute.xlu1 %706 }
 0x325   : > { %710 = vst.msk [vmem:[#allocation2 + $0x28] sm:$0xff] %vm683_vm2, %v707_v32 }
 0x328   : > { %v712_v33 = vpop.permute.xlu1 %711  ;;  %v745_v34 = vld [vmem:[#allocation2 + $0x20] sm:$0xff]  ;;  %v742_v38 = vld [vmem:[#allocation2 + $0x8] sm:$0xff] }
 0x329   : > { %715 = vst.msk [vmem:[#allocation2 + $0x30] sm:$0xff] %vm683_vm2, %v712_v33  ;;  %3159 = vmatpush3.xpose.msk.msra.mxu1 %vm683_vm2, %v745_v34 }
 0x32a   : > { %3163 = vmatprep.subr.mxu1 %v3723_v15 }
 0x32c   : > { %v717_v36 = vpop.permute.xlu1 %716  ;;  %3161 = vmatmul.mubr.msk.f32.vlgmr.msra.gmra.mrb[2].mxu1 %vm683_vm2, %v741_v35  ;;  %v746_v37 = vld [vmem:[#allocation2 + $0x28] sm:$0xff] }
 0x32d   : > { %720 = vst.msk [vmem:[#allocation2 + $0x38] sm:$0xff] %vm683_vm2, %v717_v36  ;;  %3164 = vmatpush3.xpose.msk.msra.mxu1 %vm683_vm2, %v746_v37  ;;  %3165 = vmatprep.mubr.msk.f32.mxu1 %vm3722_vm1, %v3723_v15 }
 0x32e   : > { %3173 = vmatprep.subr.mxu1 %v3723_v15 }
 0x330   : > { %v692_v39 = vpop.permute.xlu1 %691  ;;  %3166 = vmatmul.mubr.msk.f32.vlgmr.msra.gmra.mrb[4].mxu1 %vm683_vm2, %v742_v38  ;;  %v747_v40 = vld [vmem:[#allocation2 + $0x30] sm:$0xff] }
 0x331   : > { %695 = vst.msk [vmem:[#allocation2 + $0x10] sm:$0xff] %vm683_vm2, %v692_v39  ;;  %3169 = vmatpush3.xpose.msk.msra.mxu0 %vm683_vm2, %v747_v40  ;;  %3175 = vmatprep.mubr.msk.f32.mxu1 %vm3722_vm1, %v3723_v15 }
 0x332   : > { %3178 = vmatprep.subr.mxu0 %v3723_v15 }
 0x334   : > { %v697_v41 = vpop.permute.xlu1 %696  ;;  %v748_v42 = vld [vmem:[#allocation2 + $0x38] sm:$0xff] }
 0x335   : > { %700 = vst.msk [vmem:[#allocation2 + $0x18] sm:$0xff] %vm683_vm2, %v697_v41  ;;  %3174 = vmatpush3.xpose.msk.msra.mxu1 %vm683_vm2, %v748_v42 }
 0x336   : > { %3183 = vmatprep.subr.mxu1 %v3723_v15 }
 0x338   : > { %v743_v43 = vld [vmem:[#allocation2 + $0x10] sm:$0xff] }
 0x339   : > { %3171 = vmatmul.mubr.msk.f32.vlgmr.msra.gmra.mrb[0].mxu0 %vm683_vm2, %v743_v43 }
 0x33a   : > { %3180 = vmatprep.mubr.msk.f32.mxu0 %vm3722_vm1, %v3723_v15 }
 0x33c   : > { %v744_v44 = vld [vmem:[#allocation2 + $0x18] sm:$0xff] }
 0x33d   : > { %3176 = vmatmul.mubr.msk.f32.vlgmr.msra.gmra.mrb[6].mxu1 %vm683_vm2, %v744_v44 }
 0x33e   : > { %3185 = vmatprep.mubr.msk.f32.mxu1 %vm3722_vm1, %v3723_v15 }
 0x3ff   : > { %v825_v45 = vpop.f32.mrb[2].mxu1 }
 0x400   : > { %v1057_v47 = vmul.f32 0.35355338, %v825_v45  ;;  %v3162_v48 = vpop.f32.mrb[3].mxu1 }
 0x401   : > { %v1427_v48 = vld [vmem:[%s4505_s7] sm:$0xff] }
 0x402   : > { %v1067_v49 = vadd.f32 %v4107_v46, %v1057_v47 }
 0x403   : > { %v901_v50 = vpop.f32.mrb[4].mxu1 }
 0x404   : > { %v1058_v51 = vmul.f32 0.35355338, %v901_v50  ;;  %v3167_v52 = vpop.f32.mrb[5].mxu1  ;;  %v1071_v53 = vsel %vm683_vm2, %v1067_v49, -inf }
 0x405   : > { %1072 = vmax.xlane.f32.xlu1 %v1071_v53  ;;  %v1430_v52 = vld [vmem:[%s4505_s7 + $0x18] sm:$0xff] }
 0x406   : > { %v1068_v54 = vadd.f32 %v4107_v46, %v1058_v51  ;;  %v1429_v51 = vld [vmem:[%s4505_s7 + $0x10] sm:$0xff] }
 0x407   : > { %v3341_v53 = vpack.c.bf16 %v1430_v52, %v1429_v51  ;;  %v3015_v51 = vld [vmem:[%s4569_s16] ss:$0 sm:$0xff] }
 0x408   : > { %v1074_v55 = vsel %vm683_vm2, %v1068_v54, -inf }
 0x409   : > { %1075 = vmax.xlane.f32.xlu0 %v1074_v55 }
 0x40c   : > { %v977_v56 = vpop.f32.mrb[0].mxu0 }
 0x40d   : > { %v1059_v57 = vmul.f32 0.35355338, %v977_v56  ;;  %v3172_v58 = vpop.f32.mrb[1].mxu0 }
 0x40f   : > { %v1069_v59 = vadd.f32 %v4107_v46, %v1059_v57 }
 0x410   : > { %v1053_v60 = vpop.f32.mrb[6].mxu1 }
 0x411   : > { %v1060_v61 = vmul.f32 0.35355338, %v1053_v60  ;;  %v3177_v62 = vpop.f32.mrb[7].mxu1  ;;  %v1077_v63 = vsel %vm683_vm2, %v1069_v59, -inf }
 0x412   : > { %1078 = vmax.xlane.f32.xlu1 %v1077_v63 }
 0x413   : > { %v1070_v0 = vadd.f32 %v4107_v46, %v1060_v61 }
 0x415   : > { %v1080_v1 = vsel %vm683_vm2, %v1070_v0, -inf }
 0x416   : > { %1081 = vmax.xlane.f32.xlu0 %v1080_v1 }
 0x423   : > { %721 = vrot.lane.b32.xlu1 %v4057_v28, %s4528_s17  ;;  %s4570_s17 = smov 88  }
 0x492   : > { %v1073_v2 = vpop.xlane.xlu1 %1072 }
 0x493   : > { %v1083_v3 = vsub.f32 %v1067_v49, %v1073_v2  ;;  %v1428_v49 = vld [vmem:[%s4505_s7 + $0x8] sm:$0xff] }
 0x494   : > { %v3338_v50 = vpack.c.bf16 %v1428_v49, %v1427_v48 }
 0x495   : > { %v1087_v4 = vmul.f32 1.442695, %v1083_v3 }
 0x496   : > { %v1076_v5 = vpop.xlane.xlu0 %1075 }
 0x497   : > { %3487 = vpow2.f32 %v1087_v4  ;;  %v1084_v6 = vsub.f32 %v1068_v54, %v1076_v5 }
 0x499   : > { %v1089_v7 = vmul.f32 1.442695, %v1084_v6 }
 0x49b   : > { %3489 = vpow2.f32 %v1089_v7 }
 0x49f   : > { %v1079_v8 = vpop.xlane.xlu1 %1078 }
 0x4a0   : > { %v1085_v9 = vsub.f32 %v1069_v59, %v1079_v8 }
 0x4a1   : > { %v3488_v10 = vpop.eup %3487 }
 0x4a2   : > { %v1091_v11 = vmul.f32 1.442695, %v1085_v9  ;;  %v1095_v13 = vsel %vm683_vm2, %v3488_v10, 0.0 }
 0x4a3   : > { %1096 = vadd.xlane.f32.xlu1 %v1095_v13  ;;  %v722_v14 = vpop.permute.xlu1 %721  ;;  %v1082_v16 = vpop.xlane.xlu0 %1081  ;;  %v1536_v13 = vld [vmem:[%s4509_s11 + $0x8] sm:$0xff] }
 0x4a4   : > { %3491 = vpow2.f32 %v1091_v11  ;;  %725 = vst.msk [vmem:[#allocation2 + $0x40] sm:$0xff] %vm683_vm2, %v722_v14  ;;  %v1086_v17 = vsub.f32 %v1070_v0, %v1082_v16  ;;  %v3011_v0 = vld [vmem:[%s4506_s8] ss:$0 sm:$0xff]  ;;  %v1538_v16 = vld [vmem:[%s4509_s11 + $0x18] sm:$0xff] }
 0x4a5   : > { %v3490_v18 = vpop.eup %3489  ;;  %v1535_v11 = vld [vmem:[%s4509_s11] sm:$0xff] }
 0x4a6   : > { %v1093_v19 = vmul.f32 1.442695, %v1086_v17  ;;  %v1098_v20 = vsel %vm683_vm2, %v3490_v18, 0.0  ;;  %v3344_v14 = vpack.c.bf16 %v1536_v13, %v1535_v11 }
 0x4a7   : > { %1099 = vadd.xlane.f32.xlu0 %v1098_v20  ;;  %v1622_v20 = vld [vmem:[%s4511_s13 + $0x10] sm:$0xff] }
 0x4a8   : > { %3493 = vpow2.f32 %v1093_v19  ;;  %v1621_v19 = vld [vmem:[%s4511_s13 + $0x8] sm:$0xff] }
 0x4ab   : > { %v749_v21 = vld [vmem:[#allocation2 + $0x40] sm:$0xff] }
 0x4ac   : > { %3179 = vmatpush3.msra.mxu0 %v749_v21 }
 0x4ad   : > { %3188 = vmatprep.subr.mxu0 %v3723_v15 }
 0x4ae   : > { %v3492_v22 = vpop.eup %3491 }
 0x4af   : > { %v1101_v23 = vsel %vm683_vm2, %v3492_v22, 0.0 }
 0x4b0   : > { %1102 = vadd.xlane.f32.xlu1 %v1101_v23 }
 0x4b2   : > { %v3494_v24 = vpop.eup %3493 }
 0x4b3   : > { %v1104_v26 = vsel %vm683_vm2, %v3494_v24, 0.0 }
 0x4b4   : > { %1105 = vadd.xlane.f32.xlu0 %v1104_v26  ;;  %v1625_v26 = vld [vmem:[%s4511_s13 + $0x28] sm:$0xff] }
 0x4c1   : > { %731 = vrot.lane.b32.xlu1 %v4057_v28, %s4527_s23  ;;  %s4533_s23 = smov 8  }
 0x4c5   : > { %736 = vrot.lane.b32.xlu1 %v4057_v28, %s4526_s28  ;;  %s4571_s28 = smov 96  }
 0x4ca   : > { %726 = vrot.lane.b32.xlu0 %v4057_v28, %s4525_s10  ;;  %s4566_s10 = sld [smem:[#allocation22_spill]] }
 0x530   : > { %v1097_v27 = vpop.xlane.xlu1 %1096 }
 0x531   : > { %3495 = vrcp.f32 %v1097_v27 }
 0x534   : > { %v1100_v31 = vpop.xlane.xlu0 %1099 }
 0x53b   : > { %v3496_v29 = vpop.eup %3495 }
 0x53c   : > { %v1111_v30 = vmul.f32 %v3496_v29, %v3488_v10 }
 0x53d   : > { %v1103_v32 = vpop.xlane.xlu1 %1102 }
 0x53e   : > { %3497 = vrcp.f32 %v1103_v32  ;;  %3181 = vmatmul.mubr.msk.f32.vlgmr.msra.gmra.mrb[2].mxu0 %vm683_vm2, %v1111_v30 }
 0x53f   : > { %3190 = vmatprep.mubr.msk.f32.mxu0 %vm3722_vm1, %v3723_v15  ;;  %3499 = vrcp.f32 %v1100_v31  ;;  %v1525_v31 = vlaneseq }
 0x541   : > { %v732_v33 = vpop.permute.xlu1 %731  ;;  %v1106_v34 = vpop.xlane.xlu0 %1105 }
 0x542   : > { %735 = vst.msk [vmem:[#allocation2 + $0x50] sm:$0xff] %vm683_vm2, %v732_v33  ;;  %3501 = vrcp.f32 %v1106_v34  ;;  %v1526_v33 = vshrl.u32 %v1525_v31, 7 }
 0x544   : > { %v4214_v34 = vsub.s32 0, %v1526_v33 }
 0x545   : > { %v737_v35 = vpop.permute.xlu1 %736  ;;  %v727_v28 = vpop.permute.xlu0 %726 }
 0x546   : > { %740 = vst.msk [vmem:[#allocation2 + $0x58] sm:$0xff] %vm683_vm2, %v737_v35  ;;  %730 = vst.msk [vmem:[#allocation2 + $0x48] sm:$0xff] %vm683_vm2, %v727_v28  ;;  %v597_v35 = vld [vmem:[%s4566_s10] sm:$0x3] }
 0x548   : > { %v3498_v36 = vpop.eup %3497 }
 0x549   : > { %v1113_v37 = vmul.f32 %v3498_v36, %v3492_v22  ;;  %v751_v38 = vld [vmem:[#allocation2 + $0x50] sm:$0xff]  ;;  %v3500_v39 = vpop.eup %3499  ;;  %v1623_v22 = vld [vmem:[%s4511_s13 + $0x18] sm:$0xff]  ;;  %v1528_v36 = vrot.slane %v597_v35, %v4214_v34 }
 0x54a   : > { %3189 = vmatpush3.msra.mxu0 %v751_v38  ;;  %v1112_v40 = vmul.f32 %v3500_v39, %v3490_v18  ;;  %v1620_v18 = vld [vmem:[%s4511_s13] sm:$0xff]  ;;  %v3353_v23 = vpack.c.bf16 %v1623_v22, %v1622_v20 }
 0x54b   : > { %3191 = vmatmul.mubr.msk.f32.vlgmr.msra.gmra.mrb[4].mxu0 %vm683_vm2, %v1113_v37  ;;  %3337 = vmatprep.subr.bf16.mxu0 %v3721_v12  ;;  %v3350_v21 = vpack.c.bf16 %v1621_v19, %v1620_v18 }
 0x54c   : > { %3206 = vmatprep.mubr.msk.f32.mxu0 %vm3722_vm1, %v3723_v15  ;;  %v3502_v42 = vpop.eup %3501  ;;  %3339 = vmatpush3.bf16.msra.mxu0 %v3338_v50 }
 0x54d   : > { %v750_v41 = vld [vmem:[#allocation2 + $0x48] sm:$0xff]  ;;  %v752_v43 = vld [vmem:[#allocation2 + $0x58] sm:$0xff]  ;;  %v1114_v44 = vmul.f32 %v3502_v42, %v3494_v24  ;;  %3340 = vmatprep.subr.bf16.mxu0 %v3721_v12  ;;  %v1624_v24 = vld [vmem:[%s4511_s13 + $0x20] sm:$0xff] }
 0x54e   : > { %3184 = vmatpush3.msra.mxu1 %v750_v41  ;;  %v3356_v27 = vpack.c.bf16 %v1625_v26, %v1624_v24  ;;  %v1626_v42 = vld [vmem:[%s4511_s13 + $0x30] sm:$0xff] }
 0x54f   : > { %3186 = vmatmul.mubr.msk.f32.vlgmr.msra.gmra.mrb[8].mxu1 %vm683_vm2, %v1112_v40  ;;  %3193 = vmatprep.subr.mxu1 %v3723_v15 }
 0x550   : > { %3194 = vmatpush3.msra.mxu1 %v752_v43  ;;  %3195 = vmatprep.mubr.msk.f32.mxu1 %vm3722_vm1, %v3723_v15  ;;  %v1627_v43 = vld [vmem:[%s4511_s13 + $0x38] sm:$0xff] }
 0x551   : > { %3343 = vmatprep.subr.bf16.mxu1 %v3721_v12  ;;  %3342 = vmatpush3.bf16.msra.mxu0 %v3341_v53 }
 0x552   : > { %3349 = vmatprep.subr.bf16.mxu0 %v3721_v12 }
 0x553   : > { %3196 = vmatmul.mubr.msk.f32.vlgmr.msra.gmra.mrb[10].mxu1 %vm683_vm2, %v1114_v44  ;;  %v3359_v44 = vpack.c.bf16 %v1627_v43, %v1626_v42 }
 0x554   : > { %3217 = vmatprep.mubr.msk.f32.mxu1 %vm3722_vm1, %v3723_v15  ;;  %3345 = vmatpush3.bf16.msra.mxu1 %v3344_v14 }
 0x555   : > { %3346 = vmatprep.subr.bf16.mxu1 %v3721_v12 }
 0x611   : > { %v1184_v45 = vpop.f32.mrb[2].mxu0 }
 0x612   : > { %1407 = vst.msk [vmem:[#allocation3] sm:$0xff] %vm683_vm2, %v1184_v45  ;;  %v3182_v47 = vpop.f32.mrb[3].mxu0  ;;  %v3013_v45 = vld [vmem:[%s4568_s14] ss:$0 sm:$0xff] }
 0x61e   : > { %v1330_v54 = vpop.f32.mrb[4].mxu0 }
 0x61f   : > { %1415 = vrot.lane.b32.xlu1 %v1330_v54, %s4534_s25  ;;  %v3192_v55 = vpop.f32.mrb[5].mxu0  ;;  %s4567_s25 = sld [smem:[#allocation23_spill]] }
 0x622   : > { %v1257_v56 = vpop.f32.mrb[8].mxu1 }
 0x623   : > { %1409 = vrot.lane.b32.xlu0 %v1257_v56, %s4533_s23  ;;  %v3187_v57 = vpop.f32.mrb[9].mxu1  ;;  %s4575_s23 = smov 112  }
 0x625   : > { %v598_v28 = vld [vmem:[%s4567_s25] sm:$0x3] }
 0x626   : > { %v1403_v58 = vpop.f32.mrb[10].mxu1  ;;  %v1533_v39 = vrot.slane %v598_v28, %v4214_v34 }
 0x627   : > { %1421 = vrot.lane.b32.xlu0 %v1403_v58, %s4532_s9  ;;  %v3197_v59 = vpop.f32.mrb[11].mxu1  ;;  %s4574_s9 = smov 72  }
 0x691   : > { %v1416_v61 = vpop.permute.xlu1 %1415 }
 0x695   : > { %v1410_v60 = vpop.permute.xlu0 %1409 }
 0x696   : > { %1413 = vst.msk [vmem:[#allocation3] sm:$0xff] %vm1412_vm3, %v1410_v60 }
 0x697   : > { %1419 = vst.msk [vmem:[#allocation3] sm:$0xff] %vm1418_vm4, %v1416_v61 }
 0x699   : > { %v1422_v62 = vpop.permute.xlu0 %1421 }
 0x69a   : > { %1425 = vst.msk [vmem:[#allocation3] sm:$0xff] %vm1424_vm5, %v1422_v62  ;;  %v3019_v62 = vld [vmem:[%s4503_s5 + $0x20] sm:$0xff] }
 0x6a1   : > { %v1426_v63 = vld [vmem:[#allocation3] sm:$0xff] }
 0x6a2   : > { %3207 = vmatmul.mubr.msk.f32.vlgmr.msra.gmra.mrb[6].mxu0 %vm567_vm0, %v1426_v63  ;;  %v3020_v63 = vld [vmem:[%s4503_s5 + $0x28] sm:$0xff] }
 0x6a3   : > { %3236 = vmatprep.mubr.msk.f32.mxu0 %vm3722_vm1, %v3723_v15  ;;  %3351 = vmatpush3.bf16.msra.mxu0 %v3350_v21 }
 0x6a4   : > { %3352 = vmatprep.subr.bf16.mxu0 %v3721_v12 }
 0x6a7   : > { %3354 = vmatpush3.bf16.msra.mxu0 %v3353_v23 }
 0x6a8   : > { %3355 = vmatprep.subr.bf16.mxu0 %v3721_v12 }
 0x6ab   : > { %3357 = vmatpush3.bf16.msra.mxu0 %v3356_v27 }
 0x6ac   : > { %3358 = vmatprep.subr.bf16.mxu0 %v3721_v12 }
 0x6af   : > { %3360 = vmatpush3.bf16.msra.mxu0 %v3359_v44 }
 0x6b0   : > { %3260 = vmatprep.subr.mxu0 %v3723_v15 }
 0x775   : > { %v1507_v1 = vpop.f32.mrb[6].mxu0 }
 0x776   : > { %v1508_v2 = vadd.f32 %v3011_v0, %v1507_v1  ;;  %v3208_v3 = vpop.f32.mrb[7].mxu0  ;;  %v3362_v0 = vpack.c.bf16 %v3020_v63, %v3019_v62  ;;  %v3021_v1 = vld [vmem:[%s4503_s5 + $0x30] sm:$0xff] }
 0x778   : > { %v1511_v4 = vadd.f32 %v1508_v2, %v4048_v25  ;;  %v1537_v25 = vld [vmem:[%s4509_s11 + $0x10] sm:$0xff]  ;;  %v3022_v2 = vld [vmem:[%s4503_s5 + $0x38] sm:$0xff] }
 0x779   : > { %v3347_v17 = vpack.c.bf16 %v1538_v16, %v1537_v25  ;;  %v3365_v3 = vpack.c.bf16 %v3022_v2, %v3021_v1  ;;  %v3024_v25 = vld [vmem:[%s4504_s6 + $0x1] ss:$0 sm:$0xff] }
 0x77a   : > { %v1512_v5 = vsel %vm567_vm0, %v1511_v4, 0.0 }
 0x77b   : > { %1513 = vadd.xlane.f32.xlu1 %v1512_v5  ;;  %3348 = vmatpush3.bf16.msra.mxu1 %v3347_v17 }
 0x77c   : > { %3361 = vmatprep.subr.bf16.mxu1 %v3721_v12 }
 0x808   : > { %v1514_v6 = vpop.xlane.xlu1 %1513 }
 0x809   : > { %v1515_v7 = vmul.f32 0.03125, %v1514_v6 }
 0x80b   : > { %v1516_v8 = vsub.f32 %v1511_v4, %v1515_v7  ;;  %v4259_v7 = vsub.s32 1, %v1526_v33 }
 0x80d   : > { %v1517_v9 = vmul.f32 %v1516_v8, %v1516_v8  ;;  %v1731_v11 = vrot.slane %v598_v28, %v4259_v7 }
 0x80f   : > { %v1518_v10 = vsel %vm567_vm0, %v1517_v9, 0.0 }
 0x810   : > { %1519 = vadd.xlane.f32.xlu0 %v1518_v10 }
 0x89d   : > { %v1520_v29 = vpop.xlane.xlu0 %1519 }
 0x89e   : > { %v1521_v30 = vmul.f32 0.03125, %v1520_v29 }
 0x8a0   : > { %v1522_v32 = vadd.f32 1e-06, %v1521_v30 }
 0x8a2   : > { %3503 = vrsqrt.f32 %v1522_v32 }
 0x8ac   : > { %v3504_v37 = vpop.eup %3503 }
 0x8ad   : > { %v1524_v38 = vmul.f32 %v3504_v37, %v1516_v8  ;;  %v1726_v8 = vrot.slane %v597_v35, %v4259_v7 }
 0x8af   : > { %v1529_v40 = vmul.f32 %v1528_v36, %v1524_v38 }
 0x8b1   : > { %v1534_v41 = vadd.f32 %v1533_v39, %v1529_v40 }
 0x8b3   : > { %3218 = vmatmul.mubr.msk.f32.vlgmr.msra.gmra.mrb[12].mxu1 %vm567_vm0, %v1534_v41 }
 0x8b4   : > { %3247 = vmatprep.mubr.msk.f32.mxu1 %vm3722_vm1, %v3723_v15  ;;  %3363 = vmatpush3.bf16.msra.mxu1 %v3362_v0 }
 0x8b5   : > { %3364 = vmatprep.subr.bf16.mxu1 %v3721_v12 }
 0x8b8   : > { %3366 = vmatpush3.bf16.msra.mxu1 %v3365_v3 }
 0x8b9   : > { %3250 = vmatprep.subr.mxu1 %v3723_v15 }
 0x986   : > { %v1615_v47 = vpop.f32.mrb[12].mxu1 }
 0x987   : > { %v1616_v48 = vadd.f32 %v3013_v45, %v1615_v47  ;;  %v3219_v49 = vpop.f32.mrb[13].mxu1 }
 0x989   : > { %v1619_v50 = vmax.f32 %v1616_v48, 0.0 }
 0x98b   : > { %3237 = vmatmul.mubr.msk.f32.vlgmr.msra.gmra.mrb[8].mxu0 %vm1635_vm6, %v1619_v50 }
 0x98c   : > { %3262 = vmatprep.mubr.msk.f32.mxu0 %vm3722_vm1, %v3723_v15 }
 0xa5e   : > { %v1705_v52 = vpop.f32.mrb[8].mxu0 }
 0xa5f   : > { %v1706_v53 = vadd.f32 %v3015_v51, %v1705_v52  ;;  %v3238_v54 = vpop.f32.mrb[9].mxu0 }
 0xa61   : > { %v1709_v55 = vadd.f32 %v1706_v53, %v1534_v41 }
 0xa63   : > { %v1710_v56 = vsel %vm567_vm0, %v1709_v55, 0.0 }
 0xa64   : > { %1711 = vadd.xlane.f32.xlu0 %v1710_v56 }
 0xaf1   : > { %v1712_v57 = vpop.xlane.xlu0 %1711 }
 0xaf2   : > { %v1713_v58 = vmul.f32 0.03125, %v1712_v57 }
 0xaf4   : > { %v1714_v59 = vsub.f32 %v1709_v55, %v1713_v58 }
 0xaf6   : > { %v1715_v60 = vmul.f32 %v1714_v59, %v1714_v59 }
 0xaf8   : > { %v1716_v61 = vsel %vm567_vm0, %v1715_v60, 0.0 }
 0xaf9   : > { %1717 = vadd.xlane.f32.xlu1 %v1716_v61 }
 0xb86   : > { %v1718_v4 = vpop.xlane.xlu1 %1717 }
 0xb87   : > { %v1719_v5 = vmul.f32 0.03125, %v1718_v4 }
 0xb89   : > { %v1720_v6 = vadd.f32 1e-06, %v1719_v5 }
 0xb8b   : > { %3505 = vrsqrt.f32 %v1720_v6 }
 0xb95   : > { %v3506_v9 = vpop.eup %3505 }
 0xb96   : > { %v1722_v10 = vmul.f32 %v3506_v9, %v1714_v59 }
 0xb98   : > { %v1727_v13 = vmul.f32 %v1726_v8, %v1722_v10 }
 0xb9a   : > { %v4263_v14 = vadd.f32 %v1731_v11, %v1727_v13 }
 0xb9c   : > { %3248 = vmatmul.mubr.msk.f32.vlgmr.msra.gmra.mrb[14].mxu1 %vm567_vm0, %v4263_v14 }
 0xb9d   : > { %3252 = vmatprep.mubr.msk.f32.mxu1 %vm3722_vm1, %v3723_v15 }
 0xc6f   : > { %v1819_v16 = vpop.f32.mrb[14].mxu1 }
 0xc70   : > { %v4272_v17 = vadd.f32 %v3024_v25, %v1819_v16  ;;  %v3249_v18 = vpop.f32.mrb[15].mxu1 }
 0xc72   : > { %1823 = vst.msk [vmem:[#allocation2] sm:$0xff] %vm683_vm2, %v4272_v17  ;;  %1841 = vrot.lane.b32.xlu1 %v4272_v17, %s4570_s17  ;;  %1837 = vrot.lane.b32.xlu0 %v4272_v17, %s4571_s28  ;;  %s4578_s17 = smov 48   ;;  %s4579_s28 = smov 40  }
 0xc76   : > { %1825 = vrot.lane.b32.xlu1 %v4272_v17, %s4572_s27  ;;  %1845 = vrot.lane.b32.xlu0 %v4272_v17, %s4573_s30  ;;  %s4580_s27 = smov 56   ;;  %s4581_s30 = smov 16  }
 0xc79   : > { %v1869_v27 = vld [vmem:[#allocation2] sm:$0xff] }
 0xc7a   : > { %1849 = vrot.lane.b32.xlu1 %v4272_v17, %s4574_s9  ;;  %1829 = vrot.lane.b32.xlu0 %v4272_v17, %s4575_s23  ;;  %s4582_s9 = smov 8   ;;  %s4583_s23 = smov 24  }
 0xc7e   : > { %1833 = vrot.lane.b32.xlu1 %v4272_v17, %s4576_s24 }
 0xce4   : > { %v1842_v19 = vpop.permute.xlu1 %1841  ;;  %v1838_v20 = vpop.permute.xlu0 %1837 }
 0xce5   : > { %1844 = vst.msk [vmem:[#allocation2 + $0x28] sm:$0xff] %vm683_vm2, %v1842_v19  ;;  %1840 = vst.msk [vmem:[#allocation2 + $0x20] sm:$0xff] %vm683_vm2, %v1838_v20 }
 0xce8   : > { %v1826_v21 = vpop.permute.xlu1 %1825  ;;  %v1846_v22 = vpop.permute.xlu0 %1845 }
 0xce9   : > { %1828 = vst.msk [vmem:[#allocation2 + $0x8] sm:$0xff] %vm683_vm2, %v1826_v21  ;;  %1848 = vst.msk [vmem:[#allocation2 + $0x30] sm:$0xff] %vm683_vm2, %v1846_v22 }
 0xcec   : > { %v1850_v23 = vpop.permute.xlu1 %1849  ;;  %v1830_v24 = vpop.permute.xlu0 %1829  ;;  %v1873_v26 = vld [vmem:[#allocation2 + $0x20] sm:$0xff]  ;;  %v1874_v30 = vld [vmem:[#allocation2 + $0x28] sm:$0xff] }
 0xced   : > { %1852 = vst.msk [vmem:[#allocation2 + $0x38] sm:$0xff] %vm683_vm2, %v1850_v23  ;;  %1832 = vst.msk [vmem:[#allocation2 + $0x10] sm:$0xff] %vm683_vm2, %v1830_v24  ;;  %3251 = vmatpush3.xpose.msk.msra.mxu1 %vm683_vm2, %v1873_v26 }
 0xcee   : > { %3255 = vmatprep.subr.mxu1 %v3723_v15 }
 0xcf0   : > { %v1834_v29 = vpop.permute.xlu1 %1833  ;;  %3253 = vmatmul.mubr.msk.f32.vlgmr.msra.gmra.mrb[16].mxu1 %vm683_vm2, %v1869_v27  ;;  %v1875_v31 = vld [vmem:[#allocation2 + $0x30] sm:$0xff]  ;;  %v1870_v32 = vld [vmem:[#allocation2 + $0x8] sm:$0xff] }
 0xcf1   : > { %1836 = vst.msk [vmem:[#allocation2 + $0x18] sm:$0xff] %vm683_vm2, %v1834_v29  ;;  %3256 = vmatpush3.xpose.msk.msra.mxu1 %vm683_vm2, %v1874_v30  ;;  %3261 = vmatpush3.xpose.msk.msra.mxu0 %vm683_vm2, %v1875_v31 }
 0xcf2   : > { %3257 = vmatprep.mubr.msk.f32.mxu1 %vm3722_vm1, %v3723_v15  ;;  %3265 = vmatprep.subr.mxu1 %v3723_v15 }
 0xcf3   : > { %3270 = vmatprep.subr.mxu0 %v3723_v15 }
 0xcf4   : > { %3258 = vmatmul.mubr.msk.f32.vlgmr.msra.gmra.mrb[18].mxu1 %vm683_vm2, %v1870_v32  ;;  %v1871_v33 = vld [vmem:[#allocation2 + $0x10] sm:$0xff]  ;;  %v1876_v35 = vld [vmem:[#allocation2 + $0x38] sm:$0xff] }
 0xcf5   : > { %3263 = vmatmul.mubr.msk.f32.vlgmr.msra.gmra.mrb[10].mxu0 %vm683_vm2, %v1871_v33  ;;  %3266 = vmatpush3.xpose.msk.msra.mxu1 %vm683_vm2, %v1876_v35 }
 0xcf6   : > { %3267 = vmatprep.mubr.msk.f32.mxu1 %vm3722_vm1, %v3723_v15  ;;  %3272 = vmatprep.mubr.msk.f32.mxu0 %vm3722_vm1, %v3723_v15 }
 0xcf7   : > { %3275 = vmatprep.subr.mxu1 %v3723_v15 }
 0xcf8   : > { %v1872_v28 = vld [vmem:[#allocation2 + $0x18] sm:$0xff] }
 0xcf9   : > { %3268 = vmatmul.mubr.msk.f32.vlgmr.msra.gmra.mrb[20].mxu1 %vm683_vm2, %v1872_v28 }
 0xcfa   : > { %3277 = vmatprep.mubr.msk.f32.mxu1 %vm3722_vm1, %v3723_v15 }
 0xdc3   : > { %v1953_v36 = vpop.f32.mrb[16].mxu1 }
 0xdc4   : > { %v2185_v37 = vmul.f32 0.35355338, %v1953_v36  ;;  %v3254_v38 = vpop.f32.mrb[17].mxu1 }
 0xdc5   : > { %v3039_v38 = vld [vmem:[%s4505_s7 + $0x28] sm:$0xff] }
 0xdc6   : > { %v2189_v39 = vadd.f32 %v4107_v46, %v2185_v37  ;;  %v3038_v37 = vld [vmem:[%s4505_s7 + $0x20] sm:$0xff] }
 0xdc7   : > { %v2029_v40 = vpop.f32.mrb[18].mxu1 }
 0xdc8   : > { %v2186_v41 = vmul.f32 0.35355338, %v2029_v40  ;;  %v3259_v42 = vpop.f32.mrb[19].mxu1  ;;  %v2105_v43 = vpop.f32.mrb[10].mxu0  ;;  %v2193_v44 = vsel %vm683_vm2, %v2189_v39, -inf  ;;  %v3368_v40 = vpack.c.bf16 %v3039_v38, %v3038_v37 }
 0xdc9   : > { %v2187_v45 = vmul.f32 0.35355338, %v2105_v43  ;;  %v3264_v47 = vpop.f32.mrb[11].mxu0  ;;  %2194 = vmax.xlane.f32.xlu0 %v2193_v44  ;;  %v3040_v42 = vld [vmem:[%s4505_s7 + $0x30] sm:$0xff]  ;;  %v3041_v43 = vld [vmem:[%s4505_s7 + $0x38] sm:$0xff] }
 0xdca   : > { %v2190_v48 = vadd.f32 %v4107_v46, %v2186_v41  ;;  %v3371_v44 = vpack.c.bf16 %v3041_v43, %v3040_v42  ;;  %v3061_v37 = vld [vmem:[%s4569_s16 + $0x1] ss:$0 sm:$0xff] }
 0xdcb   : > { %v2191_v49 = vadd.f32 %v4107_v46, %v2187_v45 }
 0xdcc   : > { %v2181_v50 = vpop.f32.mrb[20].mxu1  ;;  %v2196_v51 = vsel %vm683_vm2, %v2190_v48, -inf }
 0xdcd   : > { %v2188_v52 = vmul.f32 0.35355338, %v2181_v50  ;;  %2197 = vmax.xlane.f32.xlu1 %v2196_v51  ;;  %v3269_v53 = vpop.f32.mrb[21].mxu1  ;;  %v2199_v54 = vsel %vm683_vm2, %v2191_v49, -inf }
 0xdce   : > { %2200 = vmax.xlane.f32.xlu0 %v2199_v54 }
 0xdcf   : > { %v2192_v55 = vadd.f32 %v4107_v46, %v2188_v52 }
 0xdd1   : > { %v2202_v56 = vsel %vm683_vm2, %v2192_v55, -inf }
 0xdd2   : > { %2203 = vmax.xlane.f32.xlu0 %v2202_v56  ;;  %v3043_v56 = vld [vmem:[%s4506_s8 + $0x1] ss:$0 sm:$0xff] }
 0xdde   : > { %1853 = vrot.lane.b32.xlu1 %v4272_v17, %s4577_s26 }
 0xe56   : > { %v2195_v57 = vpop.xlane.xlu0 %2194 }
 0xe57   : > { %v2205_v58 = vsub.f32 %v2189_v39, %v2195_v57 }
 0xe59   : > { %v2209_v59 = vmul.f32 1.442695, %v2205_v58 }
 0xe5a   : > { %v2198_v60 = vpop.xlane.xlu1 %2197 }
 0xe5b   : > { %3507 = vpow2.f32 %v2209_v59  ;;  %v2206_v61 = vsub.f32 %v2190_v48, %v2198_v60  ;;  %v2201_v62 = vpop.xlane.xlu0 %2200 }
 0xe5c   : > { %v2207_v63 = vsub.f32 %v2191_v49, %v2201_v62 }
 0xe5d   : > { %v2211_v0 = vmul.f32 1.442695, %v2206_v61 }
 0xe5e   : > { %v2213_v1 = vmul.f32 1.442695, %v2207_v63  ;;  %v1854_v2 = vpop.permute.xlu1 %1853 }
 0xe5f   : > { %3509 = vpow2.f32 %v2211_v0  ;;  %1856 = vst.msk [vmem:[#allocation2 + $0x40] sm:$0xff] %vm683_vm2, %v1854_v2  ;;  %v2204_v46 = vpop.xlane.xlu0 %2203 }
 0xe60   : > { %3511 = vpow2.f32 %v2213_v1  ;;  %v2208_v3 = vsub.f32 %v2192_v55, %v2204_v46  ;;  %v3046_v46 = vld [vmem:[%s4509_s11 + $0x28] sm:$0xff] }
 0xe62   : > { %v2215_v4 = vmul.f32 1.442695, %v2208_v3 }
 0xe64   : > { %3513 = vpow2.f32 %v2215_v4  ;;  %v3048_v4 = vld [vmem:[%s4509_s11 + $0x38] sm:$0xff] }
 0xe65   : > { %v3508_v5 = vpop.eup %3507 }
 0xe66   : > { %v2217_v6 = vsel %vm683_vm2, %v3508_v5, 0.0  ;;  %v1877_v8 = vld [vmem:[#allocation2 + $0x40] sm:$0xff] }
 0xe67   : > { %2218 = vadd.xlane.f32.xlu1 %v2217_v6  ;;  %3271 = vmatpush3.msra.mxu0 %v1877_v8  ;;  %v3052_v6 = vld [vmem:[%s4511_s13 + $0x40] sm:$0xff]  ;;  %v3053_v8 = vld [vmem:[%s4511_s13 + $0x48] sm:$0xff] }
 0xe68   : > { %3280 = vmatprep.subr.mxu0 %v3723_v15 }
 0xe69   : > { %v3510_v9 = vpop.eup %3509 }
 0xe6a   : > { %v3512_v10 = vpop.eup %3511  ;;  %v2220_v11 = vsel %vm683_vm2, %v3510_v9, 0.0 }
 0xe6b   : > { %2221 = vadd.xlane.f32.xlu0 %v2220_v11  ;;  %v2223_v13 = vsel %vm683_vm2, %v3512_v10, 0.0  ;;  %v3055_v11 = vld [vmem:[%s4511_s13 + $0x58] sm:$0xff] }
 0xe6c   : > { %2224 = vadd.xlane.f32.xlu1 %v2223_v13 }
 0xe6e   : > { %v3514_v25 = vpop.eup %3513 }
 0xe6f   : > { %v2226_v16 = vsel %vm683_vm2, %v3514_v25, 0.0 }
 0xe70   : > { %2227 = vadd.xlane.f32.xlu0 %v2226_v16  ;;  %v3057_v16 = vld [vmem:[%s4511_s13 + $0x68] sm:$0xff] }
 0xe7d   : > { %1861 = vrot.lane.b32.xlu1 %v4272_v17, %s4578_s17  ;;  %s4585_s17 = sld [smem:[#allocation26_spill]] }
 0xe81   : > { %1865 = vrot.lane.b32.xlu1 %v4272_v17, %s4579_s28 }
 0xe86   : > { %1857 = vrot.lane.b32.xlu0 %v4272_v17, %s4580_s27  ;;  %s3064_s27 = sshll.u32 %s3840_s22, 7  ;;  %s3738_s22 = smov [#allocation12]  }
 0xe87   : > { %s4453_s28 = scalar_lea.hbm %s4585_s17, %s3064_s27 }
 0xef4   : > { %v2219_v18 = vpop.xlane.xlu1 %2218 }
 0xef5   : > { %3515 = vrcp.f32 %v2219_v18 }
 0xef8   : > { %v2222_v19 = vpop.xlane.xlu0 %2221 }
 0xef9   : > { %v2225_v20 = vpop.xlane.xlu1 %2224 }
 0xefa   : > { %3517 = vrcp.f32 %v2225_v20 }
 0xefb   : > { %3519 = vrcp.f32 %v2222_v19 }
 0xefd   : > { %v1862_v21 = vpop.permute.xlu1 %1861  ;;  %v2228_v22 = vpop.xlane.xlu0 %2227 }
 0xefe   : > { %1864 = vst.msk [vmem:[#allocation2 + $0x50] sm:$0xff] %vm683_vm2, %v1862_v21  ;;  %3521 = vrcp.f32 %v2228_v22  ;;  %v3017_v22 = vld [vmem:[%s4566_s10 + $0x2] sm:$0x3] }
 0xeff   : > { %v3516_v23 = vpop.eup %3515 }
 0xf00   : > { %v2233_v24 = vmul.f32 %v3516_v23, %v3508_v5  ;;  %v3018_v23 = vld [vmem:[%s4567_s25 + $0x2] sm:$0x3] }
 0xf01   : > { %v1866_v26 = vpop.permute.xlu1 %1865  ;;  %v1858_v27 = vpop.permute.xlu0 %1857 }
 0xf02   : > { %1868 = vst.msk [vmem:[#allocation2 + $0x58] sm:$0xff] %vm683_vm2, %v1866_v26  ;;  %1860 = vst.msk [vmem:[#allocation2 + $0x48] sm:$0xff] %vm683_vm2, %v1858_v27  ;;  %3273 = vmatmul.mubr.msk.f32.vlgmr.msra.gmra.mrb[12].mxu0 %vm683_vm2, %v2233_v24  ;;  %v2649_v24 = vrot.slane %v3017_v22, %v4214_v34 }
 0xf03   : > { %3282 = vmatprep.mubr.msk.f32.mxu0 %vm3722_vm1, %v3723_v15 }
 0xf04   : > { %v3518_v17 = vpop.eup %3517 }
 0xf05   : > { %v2235_v29 = vmul.f32 %v3518_v17, %v3512_v10  ;;  %v1879_v30 = vld [vmem:[#allocation2 + $0x50] sm:$0xff]  ;;  %v3520_v31 = vpop.eup %3519  ;;  %v3380_v10 = vpack.c.bf16 %v3053_v8, %v3052_v6  ;;  %v2654_v17 = vrot.slane %v3018_v23, %v4214_v34 }
 0xf06   : > { %3281 = vmatpush3.msra.mxu0 %v1879_v30  ;;  %v2234_v32 = vmul.f32 %v3520_v31, %v3510_v9  ;;  %v3054_v9 = vld [vmem:[%s4511_s13 + $0x50] sm:$0xff]  ;;  %v3059_v31 = vld [vmem:[%s4511_s13 + $0x78] sm:$0xff] }
 0xf07   : > { %3283 = vmatmul.mubr.msk.f32.vlgmr.msra.gmra.mrb[14].mxu0 %vm683_vm2, %v2235_v29  ;;  %3367 = vmatprep.subr.bf16.mxu0 %v3721_v12  ;;  %v3383_v13 = vpack.c.bf16 %v3055_v11, %v3054_v9  ;;  %v3058_v30 = vld [vmem:[%s4511_s13 + $0x70] sm:$0xff] }
 0xf08   : > { %3298 = vmatprep.mubr.msk.f32.mxu0 %vm3722_vm1, %v3723_v15  ;;  %v3522_v35 = vpop.eup %3521  ;;  %3369 = vmatpush3.bf16.msra.mxu0 %v3368_v40 }
 0xf09   : > { %v1878_v33 = vld [vmem:[#allocation2 + $0x48] sm:$0xff]  ;;  %v1880_v28 = vld [vmem:[#allocation2 + $0x58] sm:$0xff]  ;;  %v2236_v36 = vmul.f32 %v3522_v35, %v3514_v25  ;;  %3370 = vmatprep.subr.bf16.mxu0 %v3721_v12  ;;  %v3056_v25 = vld [vmem:[%s4511_s13 + $0x60] sm:$0xff] }
 0xf0a   : > { %3276 = vmatpush3.msra.mxu1 %v1878_v33  ;;  %v3386_v18 = vpack.c.bf16 %v3057_v16, %v3056_v25  ;;  %v3050_v33 = vld [vmem:[%s4568_s14 + $0x1] ss:$0 sm:$0xff] }
 0xf0b   : > { %3278 = vmatmul.mubr.msk.f32.vlgmr.msra.gmra.mrb[22].mxu1 %vm683_vm2, %v2234_v32  ;;  %3285 = vmatprep.subr.mxu1 %v3723_v15  ;;  %v3389_v32 = vpack.c.bf16 %v3059_v31, %v3058_v30 }
 0xf0c   : > { %3286 = vmatpush3.msra.mxu1 %v1880_v28  ;;  %3287 = vmatprep.mubr.msk.f32.mxu1 %vm3722_vm1, %v3723_v15 }
 0xf0d   : > { %3373 = vmatprep.subr.bf16.mxu1 %v3721_v12  ;;  %3372 = vmatpush3.bf16.msra.mxu0 %v3371_v44 }
 0xf0e   : > { %3379 = vmatprep.subr.bf16.mxu0 %v3721_v12 }
 0xf0f   : > { %3288 = vmatmul.mubr.msk.f32.vlgmr.msra.gmra.mrb[24].mxu1 %vm683_vm2, %v2236_v36 }
 0xf10   : > { %3309 = vmatprep.mubr.msk.f32.mxu1 %vm3722_vm1, %v3723_v15 }
 0xfd5   : > { %v2306_v39 = vpop.f32.mrb[12].mxu0 }
 0xfd6   : > { %2529 = vst.msk [vmem:[#allocation3] sm:$0xff] %vm683_vm2, %v2306_v39  ;;  %v3274_v41 = vpop.f32.mrb[13].mxu0 }
 0xfda   : > { %v2452_v45 = vpop.f32.mrb[14].mxu0 }
 0xfdb   : > { %2536 = vrot.lane.b32.xlu1 %v2452_v45, %s4581_s30  ;;  %v3284_v47 = vpop.f32.mrb[15].mxu0  ;;  %s4584_s30 = sshll.u32 %s4008_s15, 3 }
 0xfde   : > { %v2379_v48 = vpop.f32.mrb[22].mxu1 }
 0xfdf   : > { %2531 = vrot.lane.b32.xlu0 %v2379_v48, %s4582_s9  ;;  %v3279_v49 = vpop.f32.mrb[23].mxu1  ;;  %s558_s9 = scalar_lea.vmem [#allocation12], %s4584_s30  ;;  %s3645_s30 = sshll.u32 %s3738_s22, 4  ;;  %s3646_s30 = int_to_ptr.vmem [resolvable:$false] %s3645_s30 }
 0xfe0   : > { %s3647_s2 = scalar_lea.vmem %s3646_s30, 256 }
 0xfe2   : > { %v2525_v50 = vpop.f32.mrb[24].mxu1 }
 0xfe3   : > { %2541 = vrot.lane.b32.xlu0 %v2525_v50, %s4583_s23  ;;  %v3289_v51 = vpop.f32.mrb[25].mxu1  ;;  %s2872_s23 = sshll.u32 %s558_s9, 4  ;;  %s4455_s23 = int_to_ptr.vmem [resolvable:$true] %s2872_s23 }
 0xfe4   : > { %s3641_s1 = scalar_lea.vmem %s4455_s23, 128  ;;  %p3648_p7 = scmp.lt.s32.totalorder %s4455_s23, %s3646_s30 }
 0xfe5   : > { %p3642_p4 = scmp.ne.s32.totalorder %s4455_s23, %s3641_s1  ;;  %p3649_p10 = scmp.lt.s32.totalorder %s3647_s2, %s3641_s1 }
 0xfe7   : > { %p3643_p8 = pnand %p3642_p4, %p3963_p6  ;;  %p3650_p13 = por %p3649_p10, %p3648_p7 }
 0xfe9   : > { %p3644_p3 = pneg %p3643_p8 }
 0xfeb   : > { %p3651_p5 = pnand %p3650_p13, %p3644_p3 }
0x104d   : > { %v2537_v53 = vpop.permute.xlu1 %2536 }
0x1051   : > { %v2532_v52 = vpop.permute.xlu0 %2531 }
0x1052   : > { %2534 = vst.msk [vmem:[#allocation3] sm:$0xff] %vm1412_vm3, %v2532_v52  ;;  %v2850_v52 = vrot.slane %v3017_v22, %v4259_v7 }
0x1053   : > { %2539 = vst.msk [vmem:[#allocation3] sm:$0xff] %vm1418_vm4, %v2537_v53 }
0x1055   : > { %v2542_v54 = vpop.permute.xlu0 %2541 }
0x1056   : > { %2544 = vst.msk [vmem:[#allocation3] sm:$0xff] %vm1424_vm5, %v2542_v54 }
0x105d   : > { %v2545_v55 = vld [vmem:[#allocation3] sm:$0xff] }
0x105e   : > { %3299 = vmatmul.mubr.msk.f32.vlgmr.msra.gmra.mrb[16].mxu0 %vm567_vm0, %v2545_v55  ;;  %v2855_v55 = vrot.slane %v3018_v23, %v4259_v7 }
0x105f   : > { %3328 = vmatprep.mubr.msk.f32.mxu0 %vm3722_vm1, %v3723_v15  ;;  %v3045_v15 = vld [vmem:[%s4509_s11 + $0x20] sm:$0xff]  ;;  %3381 = vmatpush3.bf16.msra.mxu0 %v3380_v10 }
0x1060   : > { %v3374_v3 = vpack.c.bf16 %v3046_v46, %v3045_v15  ;;  %3382 = vmatprep.subr.bf16.mxu0 %v3721_v12 }
0x1062   : > { %3375 = vmatpush3.bf16.msra.mxu1 %v3374_v3 }
0x1063   : > { %3376 = vmatprep.subr.bf16.mxu1 %v3721_v12  ;;  %3384 = vmatpush3.bf16.msra.mxu0 %v3383_v13 }
0x1064   : > { %3385 = vmatprep.subr.bf16.mxu0 %v3721_v12 }
0x1067   : > { %3387 = vmatpush3.bf16.msra.mxu0 %v3386_v18 }
0x1068   : > { %3388 = vmatprep.subr.bf16.mxu0 %v3721_v12 }
0x106b   : > { %3390 = vmatpush3.bf16.msra.mxu0 %v3389_v32 }
0x1131   : > { %v2628_v57 = vpop.f32.mrb[16].mxu0 }
0x1132   : > { %v2629_v58 = vadd.f32 %v3043_v56, %v2628_v57  ;;  %v3300_v59 = vpop.f32.mrb[17].mxu0 }
0x1134   : > { %v2632_v60 = vadd.f32 %v2629_v58, %v4263_v14  ;;  %v3047_v14 = vld [vmem:[%s4509_s11 + $0x30] sm:$0xff] }
0x1135   : > { %v3377_v5 = vpack.c.bf16 %v3048_v4, %v3047_v14 }
0x1136   : > { %v2633_v61 = vsel %vm567_vm0, %v2632_v60, 0.0 }
0x1137   : > { %2634 = vadd.xlane.f32.xlu1 %v2633_v61  ;;  %3378 = vmatpush3.bf16.msra.mxu1 %v3377_v5 }
0x11c4   : > { %v2635_v62 = vpop.xlane.xlu1 %2634 }
0x11c5   : > { %v2636_v63 = vmul.f32 0.03125, %v2635_v62 }
0x11c7   : > { %v2637_v0 = vsub.f32 %v2632_v60, %v2636_v63 }
0x11c9   : > { %v2638_v1 = vmul.f32 %v2637_v0, %v2637_v0 }
0x11cb   : > { %v2639_v2 = vsel %vm567_vm0, %v2638_v1, 0.0 }
0x11cc   : > { %2640 = vadd.xlane.f32.xlu0 %v2639_v2 }
0x1259   : > { %v2641_v19 = vpop.xlane.xlu0 %2640 }
0x125a   : > { %v2642_v20 = vmul.f32 0.03125, %v2641_v19 }
0x125c   : > { %v2643_v21 = vadd.f32 1e-06, %v2642_v20 }
0x125e   : > { %3523 = vrsqrt.f32 %v2643_v21 }
0x1268   : > { %v3524_v26 = vpop.eup %3523 }
0x1269   : > { %v2645_v27 = vmul.f32 %v3524_v26, %v2637_v0 }
0x126b   : > { %v2650_v29 = vmul.f32 %v2649_v24, %v2645_v27 }
0x126d   : > { %v2655_v12 = vadd.f32 %v2654_v17, %v2650_v29 }
0x126f   : > { %3310 = vmatmul.mubr.msk.f32.vlgmr.msra.gmra.mrb[26].mxu1 %vm567_vm0, %v2655_v12 }
0x1342   : > { %v2738_v35 = vpop.f32.mrb[26].mxu1 }
0x1343   : > { %v2739_v34 = vadd.f32 %v3050_v33, %v2738_v35  ;;  %v3311_v28 = vpop.f32.mrb[27].mxu1 }
0x1345   : > { %v2742_v36 = vmax.f32 %v2739_v34, 0.0 }
0x1347   : > { %3329 = vmatmul.mubr.msk.f32.vlgmr.msra.gmra.mrb[18].mxu0 %vm1635_vm6, %v2742_v36 }
0x141a   : > { %v2829_v38 = vpop.f32.mrb[18].mxu0 }
0x141b   : > { %v2830_v39 = vadd.f32 %v3061_v37, %v2829_v38  ;;  %v3330_v40 = vpop.f32.mrb[19].mxu0 }
0x141d   : > { %v2833_v41 = vadd.f32 %v2830_v39, %v2655_v12 }
0x141f   : > { %v2834_v42 = vsel %vm567_vm0, %v2833_v41, 0.0 }
0x1420   : > { %2835 = vadd.xlane.f32.xlu0 %v2834_v42 }
0x14ad   : > { %v2836_v43 = vpop.xlane.xlu0 %2835 }
0x14ae   : > { %v2837_v44 = vmul.f32 0.03125, %v2836_v43 }
0x14b0   : > { %v2838_v45 = vsub.f32 %v2833_v41, %v2837_v44 }
0x14b2   : > { %v2839_v47 = vmul.f32 %v2838_v45, %v2838_v45 }
0x14b4   : > { %v2840_v48 = vsel %vm567_vm0, %v2839_v47, 0.0 }
0x14b5   : > { %2841 = vadd.xlane.f32.xlu1 %v2840_v48 }
0x1542   : > { %v2842_v49 = vpop.xlane.xlu1 %2841 }
0x1543   : > { %v2843_v50 = vmul.f32 0.03125, %v2842_v49 }
0x1545   : > { %v2844_v51 = vadd.f32 1e-06, %v2843_v50 }
0x1547   : > { %3525 = vrsqrt.f32 %v2844_v51 }
0x1551   : > { %v3526_v53 = vpop.eup %3525 }
0x1552   : > { %v2846_v54 = vmul.f32 %v3526_v53, %v2838_v45 }
0x1554   : > { %v2851_v56 = vmul.f32 %v2850_v52, %v2846_v54 }
0x1556   : > { %v2856_v57 = vadd.f32 %v2855_v55, %v2851_v56 }
0x1558   : > { %2857 = vst.msk [vmem:[%s558_s9] sm:$0xff] %vm567_vm0, %v2856_v57 }
0x1559   : > { %3654 = shalt.err (!%p3651_p5)
}
0x155a   : > { %s3655_s15 = scalar_lea.hbm %s4453_s28, 128  ;;  %s3659_s24 = scalar_lea.hbm %s4585_s17, 256 }
0x155b   : > { %p3656_p0 = scmp.ne.s32.totalorder %s4453_s28, %s3655_s15  ;;  %p3660_p12 = scmp.lt.u32.totalorder %s4453_s28, %s4585_s17 }
0x155c   : > { %p3661_p2 = scmp.lt.u32.totalorder %s3659_s24, %s3655_s15  ;;  %p3663_p4 = scmp.lt.u32.totalorder %s3655_s15, %s4453_s28 }
0x155d   : > { %p3657_p11 = pnand %p3656_p0, %p3963_p6 }
0x155e   : > { %p3662_p1 = por %p3661_p2, %p3660_p12 }
0x155f   : > { %p3658_p9 = pneg %p3657_p11 }
0x1560   : > { %p3664_p8 = por %p3663_p4, %p3662_p1 }
0x1562   : > { %p3665_p3 = pnand %p3664_p8, %p3658_p9 }
0x1564   : > { %3668 = shalt.err (!%p3665_p3)
}
0x1565   : > { %3405 = dma.vmem_to_hbm [thread:$0]  (%p3963_p6), %s4455_s23, 128, %s4453_s28, %s2859_s0  }
0x1566 PF: > { %s4586_s2 = sld [smem:[#allocation17_spill]]  ;;  %s4587_s1 = sld [smem:[#allocation18_spill]] }
0x1567   : > { %p4589_p10 = scmp.ge.s32.totalorder %s3715_s21, 2 }
0x156c   : > { %s2884_s30 = sand.u32 1, %s4586_s2   ;;  %p4588_p7 = scmp.ne.s32.totalorder %s4587_s1, 0 }
0x156d   : > { %s2885_s27 = scalar_lea.sflag [#allocation6], %s2884_s30 }
0x156e   : > { %p3422_p13 = pnand %p4589_p10, %p4588_p7 }
0x1570   : > { %3698 = dma.done.wait (!%p3422_p13), %s2885_s27, 128  }
0x1571   : > { %3700 = vsyncadd (!%p3422_p13), %s2885_s27, 4294967168  ;;  %p30_p5 = scmp.ge.s32.totalorder %s3949_s29, 4   ;;  %s4590_s18 = smov %s3707_s19 }
0x1572   : > { %s4591_s19 = smov %s3711_s20  ;;  %s4592_s20 = smov %s3959_s12 }
0x1573   : > { %s4593_s21 = smov %s3949_s29  ;;  %32 = sbr.rel (!%p30_p5) target bundleno = 16 (0x10), region = 161 }
0x157a   :  { %2890 = vsyncpa [#allocation5], 1 }
0x157b   :  { %2892 = vsyncpa [#allocation5 + $0x1], 1 }
0x157c   :  { %2893 = vsyncpa [#allocation8], 1 }
0x157d   :  { %2894 = vsyncpa [#allocation11], 1 }
0x157e   :  { %2895 = vsyncpa [#allocation6], 1 }
0x157f   :  { %2897 = vsyncpa [#allocation6 + $0x1], 1 }

</bundles_post_ra>
